<compile_context>
chip_gen: v5e
topology: v5e:2x2
jax: 0.10.0
libtpu: 0.0.40
codegen_flags: <defaults>
</compile_context>

<pallas_src>
import functools

import jax
import jax.numpy as jnp
from jax import lax
from jax.experimental import pallas as pl
from jax.experimental.pallas import tpu as pltpu


def gru_fc_kernel(x_ref, w_ih_ref, w_hh_ref, b_gi_ref, b_hn_ref,
                  w_fc_ref, b_fc_ref, out_ref, gi_ref,
                  *, hidden_pad, seq_len, b_tile, input_dim):
    """GRU recurrence + final Linear for one batch tile (everything VMEM-resident).

    x_ref:    (seq, B, input_dim)   f32   time-major, batch padded to 8
    w_ih_ref: (input_dim, 3*Hp)     f32   gate g lives in lanes [g*Hp, g*Hp+H), rest 0
    w_hh_ref: (Hp, 3*Hp)            bf16  rows >= H are 0, same gate-slab layout
    b_gi_ref: (1, 3*Hp)             f32   r: b_ir+b_hr, z: b_iz+b_hz, n: b_in
    b_hn_ref: (1, Hp)               f32   b_hn (stays inside r * (...))
    w_fc_ref: (Hp, OUTP)            f32   rows >= H and cols >= out_dim are 0
    b_fc_ref: (1, OUTP)             f32
    out_ref:  (B, OUTP)             f32   lane-dense (OUTP = 128-padded out_dim)
    gi_ref:   (seq, B, 3*Hp)        f32   VMEM scratch for the hoisted input projection
    """
    Hp = hidden_pad
    B = b_tile

    # Hoisted input projection: ONE MXU matmul covering every timestep of this batch
    # tile, landed in VMEM scratch (one aligned (8, 3*Hp) tile per step in the loop).
    x2 = x_ref[...].reshape(seq_len * B, input_dim)
    gi_ref[...] = (jnp.dot(x2, w_ih_ref[...],
                           preferred_element_type=jnp.float32)
                   + b_gi_ref[...]).reshape(seq_len, B, 3 * Hp)

    # Hoisted broadcast of the n-gate hidden bias (kept out of the loop; JAX won't CSE).
    b_hn_b = jnp.broadcast_to(b_hn_ref[...], (B, Hp))            # (B, Hp) f32
    w_hh = w_hh_ref[...]                                          # (Hp, 3*Hp) bf16

    h = jnp.zeros((B, Hp), jnp.float32)

    # Fully unrolled recurrence (seq is small & static): only h @ W_hh is serial per
    # step, fed in bf16 with f32 accumulation; gate math stays f32.
    for t in range(seq_len):
        gi_t = gi_ref[t]                                          # (B, 3*Hp), aligned
        gh = jnp.dot(h.astype(jnp.bfloat16), w_hh,
                     preferred_element_type=jnp.float32)          # (B, 3*Hp) f32
        r = jax.nn.sigmoid(gi_t[:, 0:Hp] + gh[:, 0:Hp])
        z = jax.nn.sigmoid(gi_t[:, Hp:2 * Hp] + gh[:, Hp:2 * Hp])
        n = jnp.tanh(gi_t[:, 2 * Hp:3 * Hp]
                     + r * (gh[:, 2 * Hp:3 * Hp] + b_hn_b))
        h = (1.0 - z) * n + z * h

    # Final Linear on the last hidden state. Padded lanes of h are exactly 0 and padded
    # rows/cols of w_fc are 0, so the lane-dense (B, OUTP) store carries zeros beyond
    # out_dim; the wrapper slices them off.
    out_ref[...] = (jnp.dot(h, w_fc_ref[...],
                            preferred_element_type=jnp.float32)
                    + b_fc_ref[...])


def _pad_gate_cols(w_t, H, Hp):
    """(K, 3H) -> (K, 3*Hp): each gate moved into its own Hp-lane slab, zero-padded."""
    K = w_t.shape[0]
    w3 = w_t.reshape(K, 3, H)
    return jnp.pad(w3, ((0, 0), (0, 0), (0, Hp - H))).reshape(K, 3 * Hp)


def gru_network_forward(x, params, *, b_tile=8):
    """x: (batch, seq, input_dim) float32 -> (batch, output_dim) float32."""
    batch, seq, input_dim = x.shape
    H = params["w_hh"].shape[1]
    out_dim = params["w_fc"].shape[0]
    Hp = -(-H // 128) * 128                      # lane-align each gate slab (64 -> 128)
    OUTP = -(-out_dim // 128) * 128              # lane-dense FC output (1 -> 128)
    Bp = -(-batch // b_tile) * b_tile            # sublane-align the batch dim (2 -> 8)

    f32 = jnp.float32
    # Time-major 3-D input, batch zero-padded to Bp rows.
    x3 = jnp.transpose(x, (1, 0, 2)).astype(f32)                            # (seq, b, in)
    x3 = jnp.pad(x3, ((0, 0), (0, Bp - batch), (0, 0)))                     # (seq, Bp, in)

    w_ih_p = _pad_gate_cols(params["w_ih"].T.astype(f32), H, Hp)            # (in, 3*Hp)
    w_hh_p = _pad_gate_cols(params["w_hh"].T.astype(f32), H, Hp)            # (H, 3*Hp)
    w_hh_p = jnp.pad(w_hh_p, ((0, Hp - H), (0, 0))).astype(jnp.bfloat16)    # (Hp, 3*Hp)

    b_ih3 = params["b_ih"].astype(f32).reshape(3, H)
    b_hh3 = params["b_hh"].astype(f32).reshape(3, H)
    # Fold biases: r/z gates get b_ih+b_hh up front, n gate gets only b_in here
    # (b_hn must remain inside r * (...) per nn.GRU semantics).
    b_gi3 = jnp.stack([b_ih3[0] + b_hh3[0], b_ih3[1] + b_hh3[1], b_ih3[2]], axis=0)
    b_gi = jnp.pad(b_gi3, ((0, 0), (0, Hp - H))).reshape(1, 3 * Hp)         # (1, 3*Hp)
    b_hn = jnp.pad(b_hh3[2].reshape(1, H), ((0, 0), (0, Hp - H)))           # (1, Hp)

    w_fc_p = jnp.pad(params["w_fc"].T.astype(f32),
                     ((0, Hp - H), (0, OUTP - out_dim)))                    # (Hp, OUTP)
    b_fc_p = jnp.pad(params["b_fc"].astype(f32).reshape(1, out_dim),
                     ((0, 0), (0, OUTP - out_dim)))                         # (1, OUTP)

    kernel = functools.partial(gru_fc_kernel, hidden_pad=Hp, seq_len=seq,
                               b_tile=b_tile, input_dim=input_dim)

    out_padded = pl.pallas_call(
        kernel,
        out_shape=jax.ShapeDtypeStruct((Bp, OUTP), f32),
        grid=(Bp // b_tile,),
        in_specs=[
            pl.BlockSpec((seq, b_tile, input_dim), lambda b: (0, b, 0)),    # x
            pl.BlockSpec((input_dim, 3 * Hp), lambda b: (0, 0)),            # w_ih
            pl.BlockSpec((Hp, 3 * Hp), lambda b: (0, 0)),                   # w_hh (bf16)
            pl.BlockSpec((1, 3 * Hp), lambda b: (0, 0)),                    # b_gi
            pl.BlockSpec((1, Hp), lambda b: (0, 0)),                        # b_hn
            pl.BlockSpec((Hp, OUTP), lambda b: (0, 0)),                     # w_fc
            pl.BlockSpec((1, OUTP), lambda b: (0, 0)),                      # b_fc
        ],
        out_specs=pl.BlockSpec((b_tile, OUTP), lambda b: (b, 0)),
        scratch_shapes=[pltpu.VMEM((seq, b_tile, 3 * Hp), f32)],
        compiler_params=pltpu.CompilerParams(
            dimension_semantics=("parallel",)),
    )(x3, w_ih_p, w_hh_p, b_gi, b_hn, w_fc_p, b_fc_p)

    return out_padded[:batch, :out_dim]


def gru_network_reference(x, params):
    """Pure-JAX f32 reference (matches torch nn.GRU + nn.Linear forward)."""
    H = params["w_hh"].shape[1]
    hi = lax.Precision.HIGHEST
    w_ih_t = params["w_ih"].T
    w_hh_t = params["w_hh"].T
    b_ih = params["b_ih"]
    b_hh = params["b_hh"]

    def step(h, x_t):
        gi = jnp.dot(x_t, w_ih_t, precision=hi) + b_ih
        gh = jnp.dot(h, w_hh_t, precision=hi) + b_hh
        r = jax.nn.sigmoid(gi[:, :H] + gh[:, :H])
        z = jax.nn.sigmoid(gi[:, H:2 * H] + gh[:, H:2 * H])
        n = jnp.tanh(gi[:, 2 * H:] + r * gh[:, 2 * H:])
        h_new = (1.0 - z) * n + z * h
        return h_new, None

    h0 = jnp.zeros((x.shape[0], H), jnp.float32)
    h_last, _ = lax.scan(step, h0, jnp.transpose(x, (1, 0, 2)))
    return jnp.dot(h_last, params["w_fc"].T, precision=hi) + params["b_fc"]


def init_params(key, input_dim, hidden_dim, output_dim):
    """Deterministic init mimicking torch's U(-1/sqrt(H), 1/sqrt(H))."""
    k_gru = 1.0 / jnp.sqrt(hidden_dim)
    k_fc = 1.0 / jnp.sqrt(hidden_dim)
    ks = jax.random.split(key, 6)
    u = lambda k, shape, s: jax.random.uniform(k, shape, jnp.float32, -s, s)
    return {
        "w_ih": u(ks[0], (3 * hidden_dim, input_dim), k_gru),
        "w_hh": u(ks[1], (3 * hidden_dim, hidden_dim), k_gru),
        "b_ih": u(ks[2], (3 * hidden_dim,), k_gru),
        "b_hh": u(ks[3], (3 * hidden_dim,), k_gru),
        "w_fc": u(ks[4], (output_dim, hidden_dim), k_fc),
        "b_fc": u(ks[5], (output_dim,), k_fc),
    }


if __name__ == "__main__":
    input_dim = 4
    hidden_dim = 64
    output_dim = 1
    batch = 2
    seq = 8

    key = jax.random.PRNGKey(0)
    k_params, k_x = jax.random.split(key)
    params = init_params(k_params, input_dim, hidden_dim, output_dim)
    x = jax.random.normal(k_x, (batch, seq, input_dim), jnp.float32)

    out = gru_network_forward(x, params)
    out = jax.block_until_ready(out)

    ref = jax.block_until_ready(gru_network_reference(x, params))
    assert out.shape == (batch, output_dim), out.shape
    # Tolerance reflects the bf16 MXU feed on the recurrence matmul (f32 accumulation);
    # observed error vs. the full-f32 reference is ~1e-3 at these sizes.
    assert jnp.allclose(out, ref, atol=5e-3, rtol=5e-3), (out, ref)

    print("KERNEL_OK")
</pallas_src>

<mosaic_0001>
module attributes {stable_mosaic.version = 11 : i64} {
  func.func @gru_fc_kernel(%arg0: i32, %arg1: memref<8x8x4xf32, #tpu.memory_space<vmem>>, %arg2: memref<4x384xf32, #tpu.memory_space<vmem>>, %arg3: memref<128x384xbf16, #tpu.memory_space<vmem>>, %arg4: memref<1x384xf32, #tpu.memory_space<vmem>>, %arg5: memref<1x128xf32, #tpu.memory_space<vmem>>, %arg6: memref<128x128xf32, #tpu.memory_space<vmem>>, %arg7: memref<1x128xf32, #tpu.memory_space<vmem>>, %arg8: memref<8x128xf32, #tpu.memory_space<vmem>>, %arg9: memref<8x8x384xf32, #tpu.memory_space<vmem>>) attributes {dimension_semantics = [#tpu.dimension_semantics<parallel>], iteration_bounds = array<i64: 1>, scalar_prefetch = 0 : i64, scratch_operands = 1 : i64, tpu.core_type = #tpu.core_type<tc>, window_params = [{transform_indices = @transform_0, window_bounds = array<i64: 8, 8, 4>}, {pipeline_mode = #tpu.pipeline_mode<synchronous>, transform_indices = @transform_1, window_bounds = array<i64: 4, 384>}, {pipeline_mode = #tpu.pipeline_mode<synchronous>, transform_indices = @transform_2, window_bounds = array<i64: 128, 384>}, {pipeline_mode = #tpu.pipeline_mode<synchronous>, transform_indices = @transform_3, window_bounds = array<i64: 1, 384>}, {pipeline_mode = #tpu.pipeline_mode<synchronous>, transform_indices = @transform_4, window_bounds = array<i64: 1, 128>}, {pipeline_mode = #tpu.pipeline_mode<synchronous>, transform_indices = @transform_5, window_bounds = array<i64: 128, 128>}, {pipeline_mode = #tpu.pipeline_mode<synchronous>, transform_indices = @transform_6, window_bounds = array<i64: 1, 128>}, {transform_indices = @transform_7, window_bounds = array<i64: 8, 128>}]} {
    %c0 = arith.constant 0 : index
    %c0_0 = arith.constant 0 : index
    %c0_1 = arith.constant 0 : index
    %0 = vector.load %arg1[%c0, %c0_0, %c0_1] : memref<8x8x4xf32, #tpu.memory_space<vmem>>, vector<8x8x4xf32>
    %1 = vector.shape_cast %0 : vector<8x8x4xf32> to vector<64x4xf32>
    %c0_2 = arith.constant 0 : index
    %c0_3 = arith.constant 0 : index
    %2 = vector.load %arg2[%c0_2, %c0_3] : memref<4x384xf32, #tpu.memory_space<vmem>>, vector<4x384xf32>
    %cst = arith.constant dense<0.000000e+00> : vector<64x384xf32>
    %3 = tpu.matmul %1, %2, %cst {dimension_numbers = #tpu.dot_dimension_numbers<[1], [0], [0], [1], [0, 0, 1, 1], [], []>} : vector<64x4xf32>, vector<4x384xf32>, vector<64x384xf32> -> vector<64x384xf32>
    %c0_4 = arith.constant 0 : index
    %c0_5 = arith.constant 0 : index
    %4 = vector.load %arg4[%c0_4, %c0_5] : memref<1x384xf32, #tpu.memory_space<vmem>>, vector<1x384xf32>
    %5 = vector.broadcast %4 : vector<1x384xf32> to vector<64x384xf32>
    %6 = arith.addf %3, %5 : vector<64x384xf32>
    %7 = vector.shape_cast %6 : vector<64x384xf32> to vector<8x8x384xf32>
    %c0_6 = arith.constant 0 : index
    %c0_7 = arith.constant 0 : index
    %c0_8 = arith.constant 0 : index
    %8 = vector.load %arg9[%c0_6, %c0_7, %c0_8] : memref<8x8x384xf32, #tpu.memory_space<vmem>>, vector<8x8x384xf32>
    tpu.vector_store %arg9[%c0_6, %c0_7, %c0_8], %7 {strides = array<i32>} : memref<8x8x384xf32, #tpu.memory_space<vmem>>, vector<8x8x384xf32>,
    %c0_9 = arith.constant 0 : index
    %c0_10 = arith.constant 0 : index
    %9 = vector.load %arg5[%c0_9, %c0_10] : memref<1x128xf32, #tpu.memory_space<vmem>>, vector<1x128xf32>
    %10 = vector.shape_cast %9 : vector<1x128xf32> to vector<1x128xf32>
    %11 = vector.broadcast %10 : vector<1x128xf32> to vector<8x128xf32>
    %c0_11 = arith.constant 0 : index
    %c0_12 = arith.constant 0 : index
    %12 = vector.load %arg3[%c0_11, %c0_12] : memref<128x384xbf16, #tpu.memory_space<vmem>>, vector<128x384xbf16>
    %cst_13 = arith.constant 0.000000e+00 : f32
    %13 = vector.broadcast %cst_13 : f32 to vector<8x128xf32>
    %c0_14 = arith.constant 0 : index
    %c0_15 = arith.constant 0 : index
    %c0_16 = arith.constant 0 : index
    %14 = vector.load %arg9[%c0_14, %c0_15, %c0_16] : memref<8x8x384xf32, #tpu.memory_space<vmem>>, vector<1x8x384xf32>
    %15 = vector.shape_cast %14 : vector<1x8x384xf32> to vector<8x384xf32>
    %16 = arith.truncf %13 : vector<8x128xf32> to vector<8x128xbf16>
    %cst_17 = arith.constant dense<0.000000e+00> : vector<8x384xf32>
    %17 = tpu.matmul %16, %12, %cst_17 {dimension_numbers = #tpu.dot_dimension_numbers<[1], [0], [0], [1], [0, 0, 1, 1], [], []>} : vector<8x128xbf16>, vector<128x384xbf16>, vector<8x384xf32> -> vector<8x384xf32>
    %18 = vector.extract_strided_slice %15 {offsets = [0, 0], sizes = [8, 128], strides = [1, 1]} : vector<8x384xf32> to vector<8x128xf32>
    %19 = vector.extract_strided_slice %17 {offsets = [0, 0], sizes = [8, 128], strides = [1, 1]} : vector<8x384xf32> to vector<8x128xf32>
    %20 = arith.addf %18, %19 : vector<8x128xf32>
    %21 = arith.negf %20 : vector<8x128xf32>
    %22 = math.exp %21 : vector<8x128xf32>
    %cst_18 = arith.constant 1.000000e+00 : f32
    %23 = vector.broadcast %cst_18 : f32 to vector<8x128xf32>
    %24 = arith.addf %23, %22 : vector<8x128xf32>
    %25 = arith.divf %23, %24 : vector<8x128xf32>
    %26 = vector.extract_strided_slice %15 {offsets = [0, 128], sizes = [8, 128], strides = [1, 1]} : vector<8x384xf32> to vector<8x128xf32>
    %27 = vector.extract_strided_slice %17 {offsets = [0, 128], sizes = [8, 128], strides = [1, 1]} : vector<8x384xf32> to vector<8x128xf32>
    %28 = arith.addf %26, %27 : vector<8x128xf32>
    %29 = arith.negf %28 : vector<8x128xf32>
    %30 = math.exp %29 : vector<8x128xf32>
    %cst_19 = arith.constant 1.000000e+00 : f32
    %31 = vector.broadcast %cst_19 : f32 to vector<8x128xf32>
    %32 = arith.addf %31, %30 : vector<8x128xf32>
    %33 = arith.divf %31, %32 : vector<8x128xf32>
    %34 = vector.extract_strided_slice %15 {offsets = [0, 256], sizes = [8, 128], strides = [1, 1]} : vector<8x384xf32> to vector<8x128xf32>
    %35 = vector.extract_strided_slice %17 {offsets = [0, 256], sizes = [8, 128], strides = [1, 1]} : vector<8x384xf32> to vector<8x128xf32>
    %36 = arith.addf %35, %11 : vector<8x128xf32>
    %37 = arith.mulf %25, %36 : vector<8x128xf32>
    %38 = arith.addf %34, %37 : vector<8x128xf32>
    %39 = math.tanh %38 : vector<8x128xf32>
    %cst_20 = arith.constant 1.000000e+00 : f32
    %40 = vector.broadcast %cst_20 : f32 to vector<8x128xf32>
    %41 = arith.subf %40, %33 : vector<8x128xf32>
    %42 = arith.mulf %41, %39 : vector<8x128xf32>
    %43 = arith.mulf %33, %13 : vector<8x128xf32>
    %44 = arith.addf %42, %43 : vector<8x128xf32>
    %c1 = arith.constant 1 : index
    %c0_21 = arith.constant 0 : index
    %c0_22 = arith.constant 0 : index
    %45 = vector.load %arg9[%c1, %c0_21, %c0_22] : memref<8x8x384xf32, #tpu.memory_space<vmem>>, vector<1x8x384xf32>
    %46 = vector.shape_cast %45 : vector<1x8x384xf32> to vector<8x384xf32>
    %47 = arith.truncf %44 : vector<8x128xf32> to vector<8x128xbf16>
    %cst_23 = arith.constant dense<0.000000e+00> : vector<8x384xf32>
    %48 = tpu.matmul %47, %12, %cst_23 {dimension_numbers = #tpu.dot_dimension_numbers<[1], [0], [0], [1], [0, 0, 1, 1], [], []>} : vector<8x128xbf16>, vector<128x384xbf16>, vector<8x384xf32> -> vector<8x384xf32>
    %49 = vector.extract_strided_slice %46 {offsets = [0, 0], sizes = [8, 128], strides = [1, 1]} : vector<8x384xf32> to vector<8x128xf32>
    %50 = vector.extract_strided_slice %48 {offsets = [0, 0], sizes = [8, 128], strides = [1, 1]} : vector<8x384xf32> to vector<8x128xf32>
    %51 = arith.addf %49, %50 : vector<8x128xf32>
    %52 = arith.negf %51 : vector<8x128xf32>
    %53 = math.exp %52 : vector<8x128xf32>
    %cst_24 = arith.constant 1.000000e+00 : f32
    %54 = vector.broadcast %cst_24 : f32 to vector<8x128xf32>
    %55 = arith.addf %54, %53 : vector<8x128xf32>
    %56 = arith.divf %54, %55 : vector<8x128xf32>
    %57 = vector.extract_strided_slice %46 {offsets = [0, 128], sizes = [8, 128], strides = [1, 1]} : vector<8x384xf32> to vector<8x128xf32>
    %58 = vector.extract_strided_slice %48 {offsets = [0, 128], sizes = [8, 128], strides = [1, 1]} : vector<8x384xf32> to vector<8x128xf32>
    %59 = arith.addf %57, %58 : vector<8x128xf32>
    %60 = arith.negf %59 : vector<8x128xf32>
    %61 = math.exp %60 : vector<8x128xf32>
    %cst_25 = arith.constant 1.000000e+00 : f32
    %62 = vector.broadcast %cst_25 : f32 to vector<8x128xf32>
    %63 = arith.addf %62, %61 : vector<8x128xf32>
    %64 = arith.divf %62, %63 : vector<8x128xf32>
    %65 = vector.extract_strided_slice %46 {offsets = [0, 256], sizes = [8, 128], strides = [1, 1]} : vector<8x384xf32> to vector<8x128xf32>
    %66 = vector.extract_strided_slice %48 {offsets = [0, 256], sizes = [8, 128], strides = [1, 1]} : vector<8x384xf32> to vector<8x128xf32>
    %67 = arith.addf %66, %11 : vector<8x128xf32>
    %68 = arith.mulf %56, %67 : vector<8x128xf32>
    %69 = arith.addf %65, %68 : vector<8x128xf32>
    %70 = math.tanh %69 : vector<8x128xf32>
    %cst_26 = arith.constant 1.000000e+00 : f32
    %71 = vector.broadcast %cst_26 : f32 to vector<8x128xf32>
    %72 = arith.subf %71, %64 : vector<8x128xf32>
    %73 = arith.mulf %72, %70 : vector<8x128xf32>
    %74 = arith.mulf %64, %44 : vector<8x128xf32>
    %75 = arith.addf %73, %74 : vector<8x128xf32>
    %c2 = arith.constant 2 : index
    %c0_27 = arith.constant 0 : index
    %c0_28 = arith.constant 0 : index
    %76 = vector.load %arg9[%c2, %c0_27, %c0_28] : memref<8x8x384xf32, #tpu.memory_space<vmem>>, vector<1x8x384xf32>
    %77 = vector.shape_cast %76 : vector<1x8x384xf32> to vector<8x384xf32>
    %78 = arith.truncf %75 : vector<8x128xf32> to vector<8x128xbf16>
    %cst_29 = arith.constant dense<0.000000e+00> : vector<8x384xf32>
    %79 = tpu.matmul %78, %12, %cst_29 {dimension_numbers = #tpu.dot_dimension_numbers<[1], [0], [0], [1], [0, 0, 1, 1], [], []>} : vector<8x128xbf16>, vector<128x384xbf16>, vector<8x384xf32> -> vector<8x384xf32>
    %80 = vector.extract_strided_slice %77 {offsets = [0, 0], sizes = [8, 128], strides = [1, 1]} : vector<8x384xf32> to vector<8x128xf32>
    %81 = vector.extract_strided_slice %79 {offsets = [0, 0], sizes = [8, 128], strides = [1, 1]} : vector<8x384xf32> to vector<8x128xf32>
    %82 = arith.addf %80, %81 : vector<8x128xf32>
    %83 = arith.negf %82 : vector<8x128xf32>
    %84 = math.exp %83 : vector<8x128xf32>
    %cst_30 = arith.constant 1.000000e+00 : f32
    %85 = vector.broadcast %cst_30 : f32 to vector<8x128xf32>
    %86 = arith.addf %85, %84 : vector<8x128xf32>
    %87 = arith.divf %85, %86 : vector<8x128xf32>
    %88 = vector.extract_strided_slice %77 {offsets = [0, 128], sizes = [8, 128], strides = [1, 1]} : vector<8x384xf32> to vector<8x128xf32>
    %89 = vector.extract_strided_slice %79 {offsets = [0, 128], sizes = [8, 128], strides = [1, 1]} : vector<8x384xf32> to vector<8x128xf32>
    %90 = arith.addf %88, %89 : vector<8x128xf32>
    %91 = arith.negf %90 : vector<8x128xf32>
    %92 = math.exp %91 : vector<8x128xf32>
    %cst_31 = arith.constant 1.000000e+00 : f32
    %93 = vector.broadcast %cst_31 : f32 to vector<8x128xf32>
    %94 = arith.addf %93, %92 : vector<8x128xf32>
    %95 = arith.divf %93, %94 : vector<8x128xf32>
    %96 = vector.extract_strided_slice %77 {offsets = [0, 256], sizes = [8, 128], strides = [1, 1]} : vector<8x384xf32> to vector<8x128xf32>
    %97 = vector.extract_strided_slice %79 {offsets = [0, 256], sizes = [8, 128], strides = [1, 1]} : vector<8x384xf32> to vector<8x128xf32>
    %98 = arith.addf %97, %11 : vector<8x128xf32>
    %99 = arith.mulf %87, %98 : vector<8x128xf32>
    %100 = arith.addf %96, %99 : vector<8x128xf32>
    %101 = math.tanh %100 : vector<8x128xf32>
    %cst_32 = arith.constant 1.000000e+00 : f32
    %102 = vector.broadcast %cst_32 : f32 to vector<8x128xf32>
    %103 = arith.subf %102, %95 : vector<8x128xf32>
    %104 = arith.mulf %103, %101 : vector<8x128xf32>
    %105 = arith.mulf %95, %75 : vector<8x128xf32>
    %106 = arith.addf %104, %105 : vector<8x128xf32>
    %c3 = arith.constant 3 : index
    %c0_33 = arith.constant 0 : index
    %c0_34 = arith.constant 0 : index
    %107 = vector.load %arg9[%c3, %c0_33, %c0_34] : memref<8x8x384xf32, #tpu.memory_space<vmem>>, vector<1x8x384xf32>
    %108 = vector.shape_cast %107 : vector<1x8x384xf32> to vector<8x384xf32>
    %109 = arith.truncf %106 : vector<8x128xf32> to vector<8x128xbf16>
    %cst_35 = arith.constant dense<0.000000e+00> : vector<8x384xf32>
    %110 = tpu.matmul %109, %12, %cst_35 {dimension_numbers = #tpu.dot_dimension_numbers<[1], [0], [0], [1], [0, 0, 1, 1], [], []>} : vector<8x128xbf16>, vector<128x384xbf16>, vector<8x384xf32> -> vector<8x384xf32>
    %111 = vector.extract_strided_slice %108 {offsets = [0, 0], sizes = [8, 128], strides = [1, 1]} : vector<8x384xf32> to vector<8x128xf32>
    %112 = vector.extract_strided_slice %110 {offsets = [0, 0], sizes = [8, 128], strides = [1, 1]} : vector<8x384xf32> to vector<8x128xf32>
    %113 = arith.addf %111, %112 : vector<8x128xf32>
    %114 = arith.negf %113 : vector<8x128xf32>
    %115 = math.exp %114 : vector<8x128xf32>
    %cst_36 = arith.constant 1.000000e+00 : f32
    %116 = vector.broadcast %cst_36 : f32 to vector<8x128xf32>
    %117 = arith.addf %116, %115 : vector<8x128xf32>
    %118 = arith.divf %116, %117 : vector<8x128xf32>
    %119 = vector.extract_strided_slice %108 {offsets = [0, 128], sizes = [8, 128], strides = [1, 1]} : vector<8x384xf32> to vector<8x128xf32>
    %120 = vector.extract_strided_slice %110 {offsets = [0, 128], sizes = [8, 128], strides = [1, 1]} : vector<8x384xf32> to vector<8x128xf32>
    %121 = arith.addf %119, %120 : vector<8x128xf32>
    %122 = arith.negf %121 : vector<8x128xf32>
    %123 = math.exp %122 : vector<8x128xf32>
    %cst_37 = arith.constant 1.000000e+00 : f32
    %124 = vector.broadcast %cst_37 : f32 to vector<8x128xf32>
    %125 = arith.addf %124, %123 : vector<8x128xf32>
    %126 = arith.divf %124, %125 : vector<8x128xf32>
    %127 = vector.extract_strided_slice %108 {offsets = [0, 256], sizes = [8, 128], strides = [1, 1]} : vector<8x384xf32> to vector<8x128xf32>
    %128 = vector.extract_strided_slice %110 {offsets = [0, 256], sizes = [8, 128], strides = [1, 1]} : vector<8x384xf32> to vector<8x128xf32>
    %129 = arith.addf %128, %11 : vector<8x128xf32>
    %130 = arith.mulf %118, %129 : vector<8x128xf32>
    %131 = arith.addf %127, %130 : vector<8x128xf32>
    %132 = math.tanh %131 : vector<8x128xf32>
    %cst_38 = arith.constant 1.000000e+00 : f32
    %133 = vector.broadcast %cst_38 : f32 to vector<8x128xf32>
    %134 = arith.subf %133, %126 : vector<8x128xf32>
    %135 = arith.mulf %134, %132 : vector<8x128xf32>
    %136 = arith.mulf %126, %106 : vector<8x128xf32>
    %137 = arith.addf %135, %136 : vector<8x128xf32>
    %c4 = arith.constant 4 : index
    %c0_39 = arith.constant 0 : index
    %c0_40 = arith.constant 0 : index
    %138 = vector.load %arg9[%c4, %c0_39, %c0_40] : memref<8x8x384xf32, #tpu.memory_space<vmem>>, vector<1x8x384xf32>
    %139 = vector.shape_cast %138 : vector<1x8x384xf32> to vector<8x384xf32>
    %140 = arith.truncf %137 : vector<8x128xf32> to vector<8x128xbf16>
    %cst_41 = arith.constant dense<0.000000e+00> : vector<8x384xf32>
    %141 = tpu.matmul %140, %12, %cst_41 {dimension_numbers = #tpu.dot_dimension_numbers<[1], [0], [0], [1], [0, 0, 1, 1], [], []>} : vector<8x128xbf16>, vector<128x384xbf16>, vector<8x384xf32> -> vector<8x384xf32>
    %142 = vector.extract_strided_slice %139 {offsets = [0, 0], sizes = [8, 128], strides = [1, 1]} : vector<8x384xf32> to vector<8x128xf32>
    %143 = vector.extract_strided_slice %141 {offsets = [0, 0], sizes = [8, 128], strides = [1, 1]} : vector<8x384xf32> to vector<8x128xf32>
    %144 = arith.addf %142, %143 : vector<8x128xf32>
    %145 = arith.negf %144 : vector<8x128xf32>
    %146 = math.exp %145 : vector<8x128xf32>
    %cst_42 = arith.constant 1.000000e+00 : f32
    %147 = vector.broadcast %cst_42 : f32 to vector<8x128xf32>
    %148 = arith.addf %147, %146 : vector<8x128xf32>
    %149 = arith.divf %147, %148 : vector<8x128xf32>
    %150 = vector.extract_strided_slice %139 {offsets = [0, 128], sizes = [8, 128], strides = [1, 1]} : vector<8x384xf32> to vector<8x128xf32>
    %151 = vector.extract_strided_slice %141 {offsets = [0, 128], sizes = [8, 128], strides = [1, 1]} : vector<8x384xf32> to vector<8x128xf32>
    %152 = arith.addf %150, %151 : vector<8x128xf32>
    %153 = arith.negf %152 : vector<8x128xf32>
    %154 = math.exp %153 : vector<8x128xf32>
    %cst_43 = arith.constant 1.000000e+00 : f32
    %155 = vector.broadcast %cst_43 : f32 to vector<8x128xf32>
    %156 = arith.addf %155, %154 : vector<8x128xf32>
    %157 = arith.divf %155, %156 : vector<8x128xf32>
    %158 = vector.extract_strided_slice %139 {offsets = [0, 256], sizes = [8, 128], strides = [1, 1]} : vector<8x384xf32> to vector<8x128xf32>
    %159 = vector.extract_strided_slice %141 {offsets = [0, 256], sizes = [8, 128], strides = [1, 1]} : vector<8x384xf32> to vector<8x128xf32>
    %160 = arith.addf %159, %11 : vector<8x128xf32>
    %161 = arith.mulf %149, %160 : vector<8x128xf32>
    %162 = arith.addf %158, %161 : vector<8x128xf32>
    %163 = math.tanh %162 : vector<8x128xf32>
    %cst_44 = arith.constant 1.000000e+00 : f32
    %164 = vector.broadcast %cst_44 : f32 to vector<8x128xf32>
    %165 = arith.subf %164, %157 : vector<8x128xf32>
    %166 = arith.mulf %165, %163 : vector<8x128xf32>
    %167 = arith.mulf %157, %137 : vector<8x128xf32>
    %168 = arith.addf %166, %167 : vector<8x128xf32>
    %c5 = arith.constant 5 : index
    %c0_45 = arith.constant 0 : index
    %c0_46 = arith.constant 0 : index
    %169 = vector.load %arg9[%c5, %c0_45, %c0_46] : memref<8x8x384xf32, #tpu.memory_space<vmem>>, vector<1x8x384xf32>
    %170 = vector.shape_cast %169 : vector<1x8x384xf32> to vector<8x384xf32>
    %171 = arith.truncf %168 : vector<8x128xf32> to vector<8x128xbf16>
    %cst_47 = arith.constant dense<0.000000e+00> : vector<8x384xf32>
    %172 = tpu.matmul %171, %12, %cst_47 {dimension_numbers = #tpu.dot_dimension_numbers<[1], [0], [0], [1], [0, 0, 1, 1], [], []>} : vector<8x128xbf16>, vector<128x384xbf16>, vector<8x384xf32> -> vector<8x384xf32>
    %173 = vector.extract_strided_slice %170 {offsets = [0, 0], sizes = [8, 128], strides = [1, 1]} : vector<8x384xf32> to vector<8x128xf32>
    %174 = vector.extract_strided_slice %172 {offsets = [0, 0], sizes = [8, 128], strides = [1, 1]} : vector<8x384xf32> to vector<8x128xf32>
    %175 = arith.addf %173, %174 : vector<8x128xf32>
    %176 = arith.negf %175 : vector<8x128xf32>
    %177 = math.exp %176 : vector<8x128xf32>
    %cst_48 = arith.constant 1.000000e+00 : f32
    %178 = vector.broadcast %cst_48 : f32 to vector<8x128xf32>
    %179 = arith.addf %178, %177 : vector<8x128xf32>
    %180 = arith.divf %178, %179 : vector<8x128xf32>
    %181 = vector.extract_strided_slice %170 {offsets = [0, 128], sizes = [8, 128], strides = [1, 1]} : vector<8x384xf32> to vector<8x128xf32>
    %182 = vector.extract_strided_slice %172 {offsets = [0, 128], sizes = [8, 128], strides = [1, 1]} : vector<8x384xf32> to vector<8x128xf32>
    %183 = arith.addf %181, %182 : vector<8x128xf32>
    %184 = arith.negf %183 : vector<8x128xf32>
    %185 = math.exp %184 : vector<8x128xf32>
    %cst_49 = arith.constant 1.000000e+00 : f32
    %186 = vector.broadcast %cst_49 : f32 to vector<8x128xf32>
    %187 = arith.addf %186, %185 : vector<8x128xf32>
    %188 = arith.divf %186, %187 : vector<8x128xf32>
    %189 = vector.extract_strided_slice %170 {offsets = [0, 256], sizes = [8, 128], strides = [1, 1]} : vector<8x384xf32> to vector<8x128xf32>
    %190 = vector.extract_strided_slice %172 {offsets = [0, 256], sizes = [8, 128], strides = [1, 1]} : vector<8x384xf32> to vector<8x128xf32>
    %191 = arith.addf %190, %11 : vector<8x128xf32>
    %192 = arith.mulf %180, %191 : vector<8x128xf32>
    %193 = arith.addf %189, %192 : vector<8x128xf32>
    %194 = math.tanh %193 : vector<8x128xf32>
    %cst_50 = arith.constant 1.000000e+00 : f32
    %195 = vector.broadcast %cst_50 : f32 to vector<8x128xf32>
    %196 = arith.subf %195, %188 : vector<8x128xf32>
    %197 = arith.mulf %196, %194 : vector<8x128xf32>
    %198 = arith.mulf %188, %168 : vector<8x128xf32>
    %199 = arith.addf %197, %198 : vector<8x128xf32>
    %c6 = arith.constant 6 : index
    %c0_51 = arith.constant 0 : index
    %c0_52 = arith.constant 0 : index
    %200 = vector.load %arg9[%c6, %c0_51, %c0_52] : memref<8x8x384xf32, #tpu.memory_space<vmem>>, vector<1x8x384xf32>
    %201 = vector.shape_cast %200 : vector<1x8x384xf32> to vector<8x384xf32>
    %202 = arith.truncf %199 : vector<8x128xf32> to vector<8x128xbf16>
    %cst_53 = arith.constant dense<0.000000e+00> : vector<8x384xf32>
    %203 = tpu.matmul %202, %12, %cst_53 {dimension_numbers = #tpu.dot_dimension_numbers<[1], [0], [0], [1], [0, 0, 1, 1], [], []>} : vector<8x128xbf16>, vector<128x384xbf16>, vector<8x384xf32> -> vector<8x384xf32>
    %204 = vector.extract_strided_slice %201 {offsets = [0, 0], sizes = [8, 128], strides = [1, 1]} : vector<8x384xf32> to vector<8x128xf32>
    %205 = vector.extract_strided_slice %203 {offsets = [0, 0], sizes = [8, 128], strides = [1, 1]} : vector<8x384xf32> to vector<8x128xf32>
    %206 = arith.addf %204, %205 : vector<8x128xf32>
    %207 = arith.negf %206 : vector<8x128xf32>
    %208 = math.exp %207 : vector<8x128xf32>
    %cst_54 = arith.constant 1.000000e+00 : f32
    %209 = vector.broadcast %cst_54 : f32 to vector<8x128xf32>
    %210 = arith.addf %209, %208 : vector<8x128xf32>
    %211 = arith.divf %209, %210 : vector<8x128xf32>
    %212 = vector.extract_strided_slice %201 {offsets = [0, 128], sizes = [8, 128], strides = [1, 1]} : vector<8x384xf32> to vector<8x128xf32>
    %213 = vector.extract_strided_slice %203 {offsets = [0, 128], sizes = [8, 128], strides = [1, 1]} : vector<8x384xf32> to vector<8x128xf32>
    %214 = arith.addf %212, %213 : vector<8x128xf32>
    %215 = arith.negf %214 : vector<8x128xf32>
    %216 = math.exp %215 : vector<8x128xf32>
    %cst_55 = arith.constant 1.000000e+00 : f32
    %217 = vector.broadcast %cst_55 : f32 to vector<8x128xf32>
    %218 = arith.addf %217, %216 : vector<8x128xf32>
    %219 = arith.divf %217, %218 : vector<8x128xf32>
    %220 = vector.extract_strided_slice %201 {offsets = [0, 256], sizes = [8, 128], strides = [1, 1]} : vector<8x384xf32> to vector<8x128xf32>
    %221 = vector.extract_strided_slice %203 {offsets = [0, 256], sizes = [8, 128], strides = [1, 1]} : vector<8x384xf32> to vector<8x128xf32>
    %222 = arith.addf %221, %11 : vector<8x128xf32>
    %223 = arith.mulf %211, %222 : vector<8x128xf32>
    %224 = arith.addf %220, %223 : vector<8x128xf32>
    %225 = math.tanh %224 : vector<8x128xf32>
    %cst_56 = arith.constant 1.000000e+00 : f32
    %226 = vector.broadcast %cst_56 : f32 to vector<8x128xf32>
    %227 = arith.subf %226, %219 : vector<8x128xf32>
    %228 = arith.mulf %227, %225 : vector<8x128xf32>
    %229 = arith.mulf %219, %199 : vector<8x128xf32>
    %230 = arith.addf %228, %229 : vector<8x128xf32>
    %c7 = arith.constant 7 : index
    %c0_57 = arith.constant 0 : index
    %c0_58 = arith.constant 0 : index
    %231 = vector.load %arg9[%c7, %c0_57, %c0_58] : memref<8x8x384xf32, #tpu.memory_space<vmem>>, vector<1x8x384xf32>
    %232 = vector.shape_cast %231 : vector<1x8x384xf32> to vector<8x384xf32>
    %233 = arith.truncf %230 : vector<8x128xf32> to vector<8x128xbf16>
    %cst_59 = arith.constant dense<0.000000e+00> : vector<8x384xf32>
    %234 = tpu.matmul %233, %12, %cst_59 {dimension_numbers = #tpu.dot_dimension_numbers<[1], [0], [0], [1], [0, 0, 1, 1], [], []>} : vector<8x128xbf16>, vector<128x384xbf16>, vector<8x384xf32> -> vector<8x384xf32>
    %235 = vector.extract_strided_slice %232 {offsets = [0, 0], sizes = [8, 128], strides = [1, 1]} : vector<8x384xf32> to vector<8x128xf32>
    %236 = vector.extract_strided_slice %234 {offsets = [0, 0], sizes = [8, 128], strides = [1, 1]} : vector<8x384xf32> to vector<8x128xf32>
    %237 = arith.addf %235, %236 : vector<8x128xf32>
    %238 = arith.negf %237 : vector<8x128xf32>
    %239 = math.exp %238 : vector<8x128xf32>
    %cst_60 = arith.constant 1.000000e+00 : f32
    %240 = vector.broadcast %cst_60 : f32 to vector<8x128xf32>
    %241 = arith.addf %240, %239 : vector<8x128xf32>
    %242 = arith.divf %240, %241 : vector<8x128xf32>
    %243 = vector.extract_strided_slice %232 {offsets = [0, 128], sizes = [8, 128], strides = [1, 1]} : vector<8x384xf32> to vector<8x128xf32>
    %244 = vector.extract_strided_slice %234 {offsets = [0, 128], sizes = [8, 128], strides = [1, 1]} : vector<8x384xf32> to vector<8x128xf32>
    %245 = arith.addf %243, %244 : vector<8x128xf32>
    %246 = arith.negf %245 : vector<8x128xf32>
    %247 = math.exp %246 : vector<8x128xf32>
    %cst_61 = arith.constant 1.000000e+00 : f32
    %248 = vector.broadcast %cst_61 : f32 to vector<8x128xf32>
    %249 = arith.addf %248, %247 : vector<8x128xf32>
    %250 = arith.divf %248, %249 : vector<8x128xf32>
    %251 = vector.extract_strided_slice %232 {offsets = [0, 256], sizes = [8, 128], strides = [1, 1]} : vector<8x384xf32> to vector<8x128xf32>
    %252 = vector.extract_strided_slice %234 {offsets = [0, 256], sizes = [8, 128], strides = [1, 1]} : vector<8x384xf32> to vector<8x128xf32>
    %253 = arith.addf %252, %11 : vector<8x128xf32>
    %254 = arith.mulf %242, %253 : vector<8x128xf32>
    %255 = arith.addf %251, %254 : vector<8x128xf32>
    %256 = math.tanh %255 : vector<8x128xf32>
    %cst_62 = arith.constant 1.000000e+00 : f32
    %257 = vector.broadcast %cst_62 : f32 to vector<8x128xf32>
    %258 = arith.subf %257, %250 : vector<8x128xf32>
    %259 = arith.mulf %258, %256 : vector<8x128xf32>
    %260 = arith.mulf %250, %230 : vector<8x128xf32>
    %261 = arith.addf %259, %260 : vector<8x128xf32>
    %c0_63 = arith.constant 0 : index
    %c0_64 = arith.constant 0 : index
    %262 = vector.load %arg6[%c0_63, %c0_64] : memref<128x128xf32, #tpu.memory_space<vmem>>, vector<128x128xf32>
    %cst_65 = arith.constant dense<0.000000e+00> : vector<8x128xf32>
    %263 = tpu.matmul %261, %262, %cst_65 {dimension_numbers = #tpu.dot_dimension_numbers<[1], [0], [0], [1], [0, 0, 1, 1], [], []>} : vector<8x128xf32>, vector<128x128xf32>, vector<8x128xf32> -> vector<8x128xf32>
    %c0_66 = arith.constant 0 : index
    %c0_67 = arith.constant 0 : index
    %264 = vector.load %arg7[%c0_66, %c0_67] : memref<1x128xf32, #tpu.memory_space<vmem>>, vector<1x128xf32>
    %265 = vector.broadcast %264 : vector<1x128xf32> to vector<8x128xf32>
    %266 = arith.addf %263, %265 : vector<8x128xf32>
    %c0_68 = arith.constant 0 : index
    %c0_69 = arith.constant 0 : index
    %267 = vector.load %arg8[%c0_68, %c0_69] : memref<8x128xf32, #tpu.memory_space<vmem>>, vector<8x128xf32>
    tpu.vector_store %arg8[%c0_68, %c0_69], %266 {strides = array<i32>} : memref<8x128xf32, #tpu.memory_space<vmem>>, vector<8x128xf32>,
    return
  }
  func.func @transform_0(%arg0: i32) -> (i32, i32, i32) {
    %c0_i32 = arith.constant 0 : i32
    %c0_i32_0 = arith.constant 0 : i32
    %c0_i32_1 = arith.constant 0 : i32
    return %c0_i32, %arg0, %c0_i32_0 : i32, i32, i32
  }
  func.func @transform_1(%arg0: i32) -> (i32, i32) {
    %c0_i32 = arith.constant 0 : i32
    %c0_i32_0 = arith.constant 0 : i32
    %c0_i32_1 = arith.constant 0 : i32
    return %c0_i32, %c0_i32_0 : i32, i32
  }
  func.func @transform_2(%arg0: i32) -> (i32, i32) {
    %c0_i32 = arith.constant 0 : i32
    %c0_i32_0 = arith.constant 0 : i32
    %c0_i32_1 = arith.constant 0 : i32
    return %c0_i32, %c0_i32_0 : i32, i32
  }
  func.func @transform_3(%arg0: i32) -> (i32, i32) {
    %c0_i32 = arith.constant 0 : i32
    %c0_i32_0 = arith.constant 0 : i32
    %c0_i32_1 = arith.constant 0 : i32
    return %c0_i32, %c0_i32_0 : i32, i32
  }
  func.func @transform_4(%arg0: i32) -> (i32, i32) {
    %c0_i32 = arith.constant 0 : i32
    %c0_i32_0 = arith.constant 0 : i32
    %c0_i32_1 = arith.constant 0 : i32
    return %c0_i32, %c0_i32_0 : i32, i32
  }
  func.func @transform_5(%arg0: i32) -> (i32, i32) {
    %c0_i32 = arith.constant 0 : i32
    %c0_i32_0 = arith.constant 0 : i32
    %c0_i32_1 = arith.constant 0 : i32
    return %c0_i32, %c0_i32_0 : i32, i32
  }
  func.func @transform_6(%arg0: i32) -> (i32, i32) {
    %c0_i32 = arith.constant 0 : i32
    %c0_i32_0 = arith.constant 0 : i32
    %c0_i32_1 = arith.constant 0 : i32
    return %c0_i32, %c0_i32_0 : i32, i32
  }
  func.func @transform_7(%arg0: i32) -> (i32, i32) {
    %c0_i32 = arith.constant 0 : i32
    %c0_i32_0 = arith.constant 0 : i32
    return %arg0, %c0_i32 : i32, i32
  }
}

</mosaic_0001>

<bundles_post_ra>
// kernel: tpu_custom_call.1
= control target key start
LH: loop header
LB: loop body
LE: loop exit
PB: predicated region body
PF: predicated region fallthrough
CT: control target
= control target key end

     0   :  { %12 = vsyncpa [#allocation4], 0  ;;  %s2064_s0 = inlined_call_operand.vmem [shape: f32[8,8,4], index: 0, kind: input, shape index: {}]   ;;  %s2065_s1 = inlined_call_operand.vmem [shape: f32[4,384], index: 1, kind: input, shape index: {}]   ;;  %s2066_s2 = inlined_call_operand.hbm [shape: bf16[128,384], index: 2, kind: input, shape index: {}]   ;;  %s2067_s3 = inlined_call_operand.vmem [shape: f32[1,384], index: 3, kind: input, shape index: {}]   ;;  %s2068_s4 = inlined_call_operand.vmem [shape: f32[1,128], index: 4, kind: input, shape index: {}]   ;;  %s2069_s5 = inlined_call_operand.hbm [shape: f32[128,128], index: 5, kind: input, shape index: {}]   ;;  %s2070_s6 = inlined_call_operand.vmem [shape: f32[1,128], index: 6, kind: input, shape index: {}]   ;;  %s2071_s7 = inlined_call_operand.hbm [shape: f32[8,128], index: 7, kind: output, shape index: {}]  }
   0x1   :  { %13 = vsyncpa [#allocation7], 0 }
   0x2   :  { %14 = vsyncpa [#allocation5], 0  ;;  %s23_s26 = sshll.u32 %s2066_s2, 4  ;;  %s1554_s27 = smov [#allocation3]   ;;  %s24_s26 = int_to_ptr.hbm [resolvable:$true] %s23_s26 }
   0x3   :  { %s25_s28 = sshll.u32 %s1554_s27, 4  ;;  %s40_s8 = sshll.u32 %s2069_s5, 4  ;;  %s26_s28 = int_to_ptr.vmem [resolvable:$true] %s25_s28  ;;  %s41_s8 = int_to_ptr.hbm [resolvable:$true] %s40_s8 }
   0x4   :  { %s1555_s9 = smov 192   ;;  %s1556_s10 = smov 12  }
   0x5   :  { %31 = dma.hbm_to_vmem [thread:$0]  %s24_s26, 3072, %s26_s28, [#allocation4], %s1555_s9, %s1555_s9, %s1556_s10  }
   0x6   :  { %s1557_s11 = smov [#allocation6]   ;;  %s1558_s13 = smov 128  }
   0x7   :  { %s42_s12 = sshll.u32 %s1557_s11, 4  ;;  %s1559_s14 = smov 8   ;;  %s43_s12 = int_to_ptr.vmem [resolvable:$true] %s42_s12 }
   0x8   :  { %48 = dma.hbm_to_vmem [thread:$0]  %s41_s8, 2048, %s43_s12, [#allocation7], %s1558_s13, %s1558_s13, %s1559_s14  }
   0x9   :  { %1548 = dma.done.wait [#allocation4], 3072  }
   0xa   :  { %1549 = vsyncadd [#allocation4], 4294964224 }
   0xb   :  { %1550 = dma.done.wait [#allocation7], 2048  }
   0xc   :  { %1551 = vsyncadd [#allocation7], 4294965248  ;;  %v1335_v0 = vld [vmem:[#allocation3 + $0xa8] sm:$0xf]  ;;  %v1383_v1 = vld [vmem:[#allocation3 + $0xb0] sm:$0xf0] }
   0xd   :  { %v1323_v2 = vld [vmem:[#allocation3 + $0x90] sm:$0xf]  ;;  %v1608_v3 = vor.u32 %v1383_v1, %v1335_v0  ;;  %v1380_v4 = vld [vmem:[#allocation3 + $0x98] sm:$0xf0]  ;;  %v1311_v7 = vld [vmem:[#allocation3 + $0x78] sm:$0xf] }
   0xe   :  { %v68_v5 = vld [vmem:[%s2065_s1] sm:$0xff]  ;;  %v1614_v6 = vor.u32 %v1380_v4, %v1323_v2  ;;  %v1377_v8 = vld [vmem:[#allocation3 + $0x80] sm:$0xf0]  ;;  %v1343_v9 = vld [vmem:[#allocation3 + $0xb0] sm:$0xf]  ;;  %vm111_vm0 = vcmask 1043456  }
   0xf   :  { %80 = vst [vmem:[#allocation1] ss:$2 sm:$0xff] %v68_v5  ;;  %432 = vmatpush.bf16.msra.mxu3 %v1608_v3  ;;  %v1384_v10 = vld [vmem:[#allocation3 + $0xb8] sm:$0xf0]  ;;  %vm86_vm1 = vcmask 31744   ;;  %v1622_v12 = vor.u32 %v1377_v8, %v1311_v7  ;;  %v1641_v26 = vld [vmem:[%s2064_s0 + $0x8] sm:$0xff] }
  0x10   :  { %v1620_v11 = vld [vmem:[%s2064_s0] sm:$0xff]  ;;  %v1299_v13 = vld [vmem:[#allocation3 + $0x60] sm:$0xf]  ;;  %v1374_v14 = vld [vmem:[#allocation3 + $0x68] sm:$0xf0]  ;;  %v1624_v15 = vor.u32 %v1384_v10, %v1343_v9  ;;  %v1560_v59 = vmov 0  }
  0x11   :  { %v1331_v16 = vld [vmem:[#allocation3 + $0x98] sm:$0xf]  ;;  %v1381_v18 = vld [vmem:[#allocation3 + $0xa0] sm:$0xf0]  ;;  %v1630_v19 = vor.u32 %v1374_v14, %v1299_v13  ;;  %v1287_v20 = vld [vmem:[#allocation3 + $0x48] sm:$0xf] }
  0x12   :  { %v1371_v21 = vld [vmem:[#allocation3 + $0x50] sm:$0xf0]  ;;  %v1633_v22 = vor.u32 %v1381_v18, %v1331_v16  ;;  %v1319_v23 = vld [vmem:[#allocation3 + $0x80] sm:$0xf]  ;;  %v1378_v24 = vld [vmem:[#allocation3 + $0x88] sm:$0xf0] }
  0x13   :  { %433 = vmatpush.bf16.msra.mxu3 %v1614_v6  ;;  %v1636_v25 = vor.u32 %v1371_v21, %v1287_v20  ;;  %v1275_v27 = vld [vmem:[#allocation3 + $0x30] sm:$0xf]  ;;  %v1368_v28 = vld [vmem:[#allocation3 + $0x38] sm:$0xf0]  ;;  %v1644_v29 = vor.u32 %v1378_v24, %v1319_v23  ;;  %v1307_v30 = vld [vmem:[#allocation3 + $0x68] sm:$0xf] }
  0x14   :  { %v1375_v31 = vld [vmem:[#allocation3 + $0x70] sm:$0xf0]  ;;  %v1649_v32 = vor.u32 %v1368_v28, %v1275_v27  ;;  %v1263_v33 = vld [vmem:[#allocation3 + $0x18] sm:$0xf]  ;;  %v1365_v34 = vld [vmem:[#allocation3 + $0x20] sm:$0xf0] }
  0x15   :  { %v1652_v35 = vor.u32 %v1375_v31, %v1307_v30  ;;  %v1658_v36 = vld [vmem:[%s2064_s0 + $0x10] sm:$0xff]  ;;  %v1660_v37 = vor.u32 %v1365_v34, %v1263_v33  ;;  %v1251_v38 = vld [vmem:[#allocation3] sm:$0xf]  ;;  %v1295_v40 = vld [vmem:[#allocation3 + $0x50] sm:$0xf]  ;;  %s1561_s14 = smov [#allocation8]  }
  0x16   :  { %v83_v17 = vld.sshfl [vmem:[#allocation1] sm:$0xff pattern:$0x75316420]  ;;  %v1362_v39 = vld [vmem:[#allocation3 + $0x8] sm:$0xf0]  ;;  %v1683_v53 = vld [vmem:[%s2064_s0 + $0x18] sm:$0xff] }
  0x17   :  { %1222 = vmatpush.msk.msra.mxu0 %vm111_vm0, %v83_v17  ;;  %434 = vmatpush.bf16.msra.mxu3 %v1622_v12  ;;  %v1372_v41 = vld [vmem:[#allocation3 + $0x58] sm:$0xf0]  ;;  %v1382_v42 = vld [vmem:[#allocation3 + $0xac] sm:$0xf]  ;;  %v1337_v43 = vld [vmem:[#allocation3 + $0xb4] sm:$0xf0]  ;;  %v1668_v45 = vor.u32 %v1362_v39, %v1251_v38 }
  0x18   :  { %1223 = vmatmul.msk.f32.vlgmr.msra.gmra.mxu0 %vm86_vm1, %v1620_v11  ;;  %v1663_v44 = vor.u32 %v1372_v41, %v1295_v40  ;;  %v1670_v46 = vor.u32 %v1382_v42, %v1337_v43  ;;  %v1379_v47 = vld [vmem:[#allocation3 + $0x94] sm:$0xf]  ;;  %v1325_v48 = vld [vmem:[#allocation3 + $0x9c] sm:$0xf0]  ;;  %v1283_v49 = vld [vmem:[#allocation3 + $0x38] sm:$0xf] }
  0x19   :  { %458 = vmatpush.bf16.msrb.mxu0 %v1624_v15  ;;  %v1369_v50 = vld [vmem:[#allocation3 + $0x40] sm:$0xf0]  ;;  %v69_v51 = vld [vmem:[%s2065_s1 + $0x8] sm:$0xf]  ;;  %v1685_v54 = vor.u32 %v1379_v47, %v1325_v48  ;;  %v1376_v55 = vld [vmem:[#allocation3 + $0x7c] sm:$0xf] }
  0x1a   :  { %v1676_v52 = vor.u32 %v1369_v50, %v1283_v49  ;;  %82 = vst [vmem:[#allocation1 + $0x10] ss:$2 sm:$0xff] %v69_v51  ;;  %v1313_v56 = vld [vmem:[#allocation3 + $0x84] sm:$0xf0]  ;;  %v1271_v57 = vld [vmem:[#allocation3 + $0x20] sm:$0xf] }
  0x1b   :  { %435 = vmatpush.bf16.msra.mxu3 %v1630_v19  ;;  %v1366_v58 = vld [vmem:[#allocation3 + $0x28] sm:$0xf0]  ;;  %v84_v60 = vld.sshfl [vmem:[#allocation1 + $0x8] sm:$0xff pattern:$0x75316420]  ;;  %v1695_v0 = vor.u32 %v1376_v55, %v1313_v56  ;;  %v1710_v7 = vld [vmem:[%s2064_s0 + $0x20] sm:$0xff] }
  0x1c   :  { %v1689_v61 = vor.u32 %v1366_v58, %v1271_v57  ;;  %1231 = vmatpush.msk.msra.mxu1 %vm111_vm0, %v84_v60  ;;  %v1259_v62 = vld [vmem:[#allocation3 + $0x8] sm:$0xf]  ;;  %v1363_v63 = vld [vmem:[#allocation3 + $0x10] sm:$0xf0]  ;;  %v1373_v1 = vld [vmem:[#allocation3 + $0x64] sm:$0xf] }
  0x1d   :  { %459 = vmatpush.bf16.msrb.mxu0 %v1633_v22  ;;  %1232 = vmatmul.msk.f32.vlgmr.msra.gmra.mxu1 %vm86_vm1, %v1620_v11  ;;  %v1301_v2 = vld [vmem:[#allocation3 + $0x6c] sm:$0xf0]  ;;  %v1700_v5 = vor.u32 %v1363_v63, %v1259_v62  ;;  %v1370_v9 = vld [vmem:[#allocation3 + $0x4c] sm:$0xf]  ;;  %v1289_v10 = vld [vmem:[#allocation3 + $0x54] sm:$0xf0] }
  0x1e   :  { %524 = vmatpush.bf16.msrb.mxu1 %v1608_v3  ;;  %v1712_v8 = vor.u32 %v1373_v1, %v1301_v2  ;;  %v1367_v13 = vld [vmem:[#allocation3 + $0x34] sm:$0xf]  ;;  %v1277_v14 = vld [vmem:[#allocation3 + $0x3c] sm:$0xf0]  ;;  %v1364_v18 = vld [vmem:[#allocation3 + $0x1c] sm:$0xf] }
  0x1f   :  { %436 = vmatpush.bf16.msra.mxu3 %v1636_v25  ;;  %v65_v16 = vld [vmem:[%s2064_s0 + $0x28] sm:$0xff]  ;;  %v1734_v17 = vor.u32 %v1367_v13, %v1277_v14  ;;  %v1265_v20 = vld [vmem:[#allocation3 + $0x24] sm:$0xf0]  ;;  %v1253_v24 = vld [vmem:[#allocation3 + $0xc] sm:$0xf0]  ;;  %s1209_s2 = sshll.u32 %s1561_s14, 4  ;;  %s1210_s2 = int_to_ptr.vmem [resolvable:$true] %s1209_s2 }
  0x20   :  { %1224 = vmatmul.msk.f32.gmra.mxu0 %vm86_vm1, %v1641_v26  ;;  %v1741_v21 = vor.u32 %v1364_v18, %v1265_v20  ;;  %v1361_v23 = vld [vmem:[#allocation3 + $0x4] sm:$0xf]  ;;  %v67_v28 = vld [vmem:[%s2064_s0 + $0x38] sm:$0xff]  ;;  %v70_v31 = vld [vmem:[%s2067_s3] sm:$0x7]  ;;  %s1211_s16 = sshll.u32 %s2071_s7, 4  ;;  %s1212_s16 = int_to_ptr.hbm [resolvable:$true] %s1211_s16 }
  0x21   :  { %460 = vmatpush.bf16.msrb.mxu0 %v1644_v29  ;;  %v85_v4 = vld.sshfl [vmem:[#allocation1 + $0x10] sm:$0xff pattern:$0x75316420]  ;;  %v1754_v27 = vor.u32 %v1361_v23, %v1253_v24  ;;  %v72_v33 = vperm.slane %v70_v31, 0  ;;  %v1844_v60 = vperm.slane %v70_v31, 1 }
  0x22   :  { %1240 = vmatpush.msk.msra.mxu2 %vm111_vm0, %v85_v4  ;;  %525 = vmatpush.bf16.msrb.mxu1 %v1614_v6  ;;  %v1852_v23 = vld [vmem:[%s2068_s4] ss:$0 sm:$0xff] }
  0x23   :  { %437 = vmatpush.bf16.msra.mxu3 %v1649_v32  ;;  %1241 = vmatmul.msk.f32.vlgmr.msra.gmra.mxu2 %vm86_vm1, %v1620_v11  ;;  %v1721_v11 = vor.u32 %v1370_v9, %v1289_v10 }
  0x24   :  { %537 = vmatpush.bf16.msrb.mxu2 %v1670_v46 }
  0x25   :  { %461 = vmatpush.bf16.msrb.mxu0 %v1652_v35  ;;  %1233 = vmatmul.msk.f32.gmra.mxu1 %vm86_vm1, %v1641_v26 }
  0x26   :  { %526 = vmatpush.bf16.msrb.mxu1 %v1622_v12 }
  0x27   :  { %438 = vmatpush.bf16.msra.mxu3 %v1660_v37 }
  0x28   :  { %1225 = vmatmul.msk.f32.gmra.mxu0 %vm86_vm1, %v1658_v36  ;;  %538 = vmatpush.bf16.msrb.mxu2 %v1685_v54 }
  0x29   :  { %462 = vmatpush.bf16.msrb.mxu0 %v1663_v44 }
  0x2a   :  { %527 = vmatpush.bf16.msrb.mxu1 %v1630_v19 }
  0x2b   :  { %439 = vmatpush.bf16.msra.mxu3 %v1668_v45  ;;  %1242 = vmatmul.msk.f32.gmra.mxu2 %vm86_vm1, %v1641_v26  ;;  %v66_v26 = vld [vmem:[%s2064_s0 + $0x30] sm:$0xff] }
  0x2c   :  { %539 = vmatpush.bf16.msrb.mxu2 %v1695_v0 }
  0x2d   :  { %463 = vmatpush.bf16.msrb.mxu0 %v1676_v52  ;;  %1234 = vmatmul.msk.f32.gmra.mxu1 %vm86_vm1, %v1658_v36 }
  0x2e   :  { %440 = vmatmul.bf16.vlgmr.msra.gmra.mxu3 %v1560_v59  ;;  %528 = vmatpush.bf16.msrb.mxu1 %v1636_v25 }
  0x2f   :  { %445 = vmatpush.bf16.msrb.mxu3 %v1670_v46 }
  0x30   :  { %1226 = vmatmul.msk.f32.gmra.mxu0 %vm86_vm1, %v1683_v53  ;;  %540 = vmatpush.bf16.msrb.mxu2 %v1712_v8 }
  0x31   :  { %464 = vmatpush.bf16.msrb.mxu0 %v1689_v61 }
  0x32   :  { %529 = vmatpush.bf16.msrb.mxu1 %v1649_v32 }
  0x33   :  { %446 = vmatpush.bf16.msrb.mxu3 %v1685_v54  ;;  %1243 = vmatmul.msk.f32.gmra.mxu2 %vm86_vm1, %v1658_v36 }
  0x34   :  { %541 = vmatpush.bf16.msrb.mxu2 %v1721_v11 }
  0x35   :  { %465 = vmatpush.bf16.msrb.mxu0 %v1700_v5  ;;  %1235 = vmatmul.msk.f32.gmra.mxu1 %vm86_vm1, %v1683_v53 }
  0x36   :  { %530 = vmatpush.bf16.msrb.mxu1 %v1660_v37 }
  0x37   :  { %447 = vmatpush.bf16.msrb.mxu3 %v1695_v0 }
  0x38   :  { %1227 = vmatmul.msk.f32.gmra.mxu0 %vm86_vm1, %v1710_v7  ;;  %542 = vmatpush.bf16.msrb.mxu2 %v1734_v17 }
  0x39   :  { %616 = vmatpush.bf16.msra.mxu0 %v1608_v3 }
  0x3a   :  { %531 = vmatpush.bf16.msrb.mxu1 %v1668_v45 }
  0x3b   :  { %448 = vmatpush.bf16.msrb.mxu3 %v1712_v8  ;;  %1244 = vmatmul.msk.f32.gmra.mxu2 %vm86_vm1, %v1683_v53 }
  0x3c   :  { %543 = vmatpush.bf16.msrb.mxu2 %v1741_v21 }
  0x3d   :  { %617 = vmatpush.bf16.msra.mxu0 %v1614_v6  ;;  %1236 = vmatmul.msk.f32.gmra.mxu1 %vm86_vm1, %v1710_v7 }
  0x3e   :  { %629 = vmatpush.bf16.msra.mxu1 %v1670_v46 }
  0x3f   :  { %449 = vmatpush.bf16.msrb.mxu3 %v1721_v11 }
  0x40   :  { %1228 = vmatmul.msk.f32.gmra.mxu0 %vm86_vm1, %v65_v16  ;;  %544 = vmatpush.bf16.msrb.mxu2 %v1754_v27 }
  0x41   :  { %618 = vmatpush.bf16.msra.mxu0 %v1622_v12 }
  0x42   :  { %630 = vmatpush.bf16.msra.mxu1 %v1685_v54 }
  0x43   :  { %450 = vmatpush.bf16.msrb.mxu3 %v1734_v17  ;;  %1245 = vmatmul.msk.f32.gmra.mxu2 %vm86_vm1, %v1710_v7 }
  0x44   :  { %642 = vmatpush.bf16.msra.mxu2 %v1624_v15 }
  0x45   :  { %619 = vmatpush.bf16.msra.mxu0 %v1630_v19  ;;  %1237 = vmatmul.msk.f32.gmra.mxu1 %vm86_vm1, %v65_v16 }
  0x46   :  { %631 = vmatpush.bf16.msra.mxu1 %v1695_v0 }
  0x47   :  { %451 = vmatpush.bf16.msrb.mxu3 %v1741_v21 }
  0x48   :  { %1229 = vmatmul.msk.f32.gmra.mxu0 %vm86_vm1, %v66_v26  ;;  %643 = vmatpush.bf16.msra.mxu2 %v1633_v22 }
  0x49   :  { %620 = vmatpush.bf16.msra.mxu0 %v1636_v25 }
  0x4a   :  { %632 = vmatpush.bf16.msra.mxu1 %v1712_v8 }
  0x4b   :  { %452 = vmatpush.bf16.msrb.mxu3 %v1754_v27  ;;  %1246 = vmatmul.msk.f32.gmra.mxu2 %vm86_vm1, %v65_v16 }
  0x4c   :  { %644 = vmatpush.bf16.msra.mxu2 %v1644_v29 }
  0x4d   :  { %621 = vmatpush.bf16.msra.mxu0 %v1649_v32  ;;  %1238 = vmatmul.msk.f32.gmra.mxu1 %vm86_vm1, %v66_v26 }
  0x4e   :  { %453 = vmatmul.bf16.vlgmr.msrb.gmra.mxu3 %v1560_v59  ;;  %633 = vmatpush.bf16.msra.mxu1 %v1721_v11 }
  0x4f   :  { %550 = vmatpush.bf16.msra.mxu3 %v1624_v15 }
  0x50   :  { %1230 = vmatmul.msk.f32.gmra.mxu0 %vm86_vm1, %v67_v28  ;;  %645 = vmatpush.bf16.msra.mxu2 %v1652_v35 }
  0x51   :  { %622 = vmatpush.bf16.msra.mxu0 %v1660_v37 }
  0x52   :  { %634 = vmatpush.bf16.msra.mxu1 %v1734_v17 }
  0x53   :  { %551 = vmatpush.bf16.msra.mxu3 %v1633_v22  ;;  %1247 = vmatmul.msk.f32.gmra.mxu2 %vm86_vm1, %v66_v26 }
  0x54   :  { %646 = vmatpush.bf16.msra.mxu2 %v1663_v44 }
  0x55   :  { %623 = vmatpush.bf16.msra.mxu0 %v1668_v45  ;;  %1239 = vmatmul.msk.f32.gmra.mxu1 %vm86_vm1, %v67_v28 }
  0x56   :  { %635 = vmatpush.bf16.msra.mxu1 %v1741_v21 }
  0x57   :  { %552 = vmatpush.bf16.msra.mxu3 %v1644_v29 }
  0x58   :  { %466 = vmatmul.bf16.vlgmr.msrb.gmra.mxu0 %v1560_v59  ;;  %647 = vmatpush.bf16.msra.mxu2 %v1676_v52 }
  0x59   :  { %721 = vmatpush.bf16.msrb.mxu0 %v1670_v46 }
  0x5a   :  { %636 = vmatpush.bf16.msra.mxu1 %v1754_v27 }
  0x5b   :  { %553 = vmatpush.bf16.msra.mxu3 %v1652_v35  ;;  %1248 = vmatmul.msk.f32.gmra.mxu2 %vm86_vm1, %v67_v28 }
  0x5c   :  { %648 = vmatpush.bf16.msra.mxu2 %v1689_v61 }
  0x5d   :  { %722 = vmatpush.bf16.msrb.mxu0 %v1685_v54 }
  0x5f   :  { %554 = vmatpush.bf16.msra.mxu3 %v1663_v44 }
  0x60   :  { %649 = vmatpush.bf16.msra.mxu2 %v1700_v5 }
  0x61   :  { %723 = vmatpush.bf16.msrb.mxu0 %v1695_v0 }
  0x63   :  { %555 = vmatpush.bf16.msra.mxu3 %v1676_v52 }
  0x65   :  { %724 = vmatpush.bf16.msrb.mxu0 %v1712_v8 }
  0x67   :  { %556 = vmatpush.bf16.msra.mxu3 %v1689_v61 }
  0x69   :  { %725 = vmatpush.bf16.msrb.mxu0 %v1721_v11 }
  0x6b   :  { %557 = vmatpush.bf16.msra.mxu3 %v1700_v5 }
  0x6d   :  { %726 = vmatpush.bf16.msrb.mxu0 %v1734_v17 }
  0x6f   :  { %708 = vmatpush.bf16.msrb.mxu3 %v1608_v3 }
  0x71   :  { %727 = vmatpush.bf16.msrb.mxu0 %v1741_v21 }
  0x73   :  { %709 = vmatpush.bf16.msrb.mxu3 %v1614_v6 }
  0x75   :  { %728 = vmatpush.bf16.msrb.mxu0 %v1754_v27 }
  0x77   :  { %710 = vmatpush.bf16.msrb.mxu3 %v1622_v12 }
  0x7b   :  { %711 = vmatpush.bf16.msrb.mxu3 %v1630_v19 }
  0x7f   :  { %712 = vmatpush.bf16.msrb.mxu3 %v1636_v25 }
  0x83   :  { %713 = vmatpush.bf16.msrb.mxu3 %v1649_v32 }
  0x87   :  { %714 = vmatpush.bf16.msrb.mxu3 %v1660_v37 }
  0x8b   :  { %715 = vmatpush.bf16.msrb.mxu3 %v1668_v45 }
  0x95   :  { %v135_v30 = vpop.f32.mrf.mxu0 }
  0x96   :  { %v136_v42 = vadd.f32 %v135_v30, %v72_v33 }
  0x9a   :  { %v176_v62 = vpop.f32.mrf.mxu1 }
  0x9b   :  { %v177_v1 = vadd.f32 %v176_v62, %v1844_v60 }
  0x9d   :  { %v138_v34 = vpop.f32.mrf.mxu0 }
  0x9e   :  { %v1832_v36 = vadd.f32 %v138_v34, %v72_v33 }
  0xa5   :  { %v141_v38 = vpop.f32.mrf.mxu0 }
  0xa6   :  { %v1834_v39 = vadd.f32 %v141_v38, %v72_v33 }
  0xad   :  { %v144_v40 = vpop.f32.mrf.mxu0 }
  0xae   :  { %v1836_v41 = vadd.f32 %v144_v40, %v72_v33  ;;  %v1855_v40 = vperm.slane %v70_v31, 2 }
  0xb1   :  { %v441_v43 = vpop.f32.mrf.mxu3 }
  0xb2   :  { %v471_v47 = vadd.f32 %v441_v43, %v136_v42 }
  0xb4   :  { %v1345_v48 = vmul.f32 -1.442695, %v471_v47  ;;  %v217_v47 = vpop.f32.mrf.mxu2 }
  0xb5   :  { %v147_v49 = vpop.f32.mrf.mxu0 }
  0xb6   :  { %v1838_v50 = vadd.f32 %v147_v49, %v72_v33  ;;  %1395 = vpow2.f32 %v1345_v48 }
  0xb9   :  { %v443_v51 = vpop.f32.mrf.mxu3 }
  0xba   :  { %v218_v51 = vadd.f32 %v217_v47, %v1855_v40 }
  0xbc   :  { %v1396_v53 = vpop.eup %1395 }
  0xbd   :  { %v150_v55 = vpop.f32.mrf.mxu0  ;;  %v475_v57 = vadd.f32 1.0, %v1396_v53 }
  0xbe   :  { %v1840_v56 = vadd.f32 %v150_v55, %v72_v33 }
  0xbf   :  { %1397 = vrcp.f32 %v475_v57  ;;  %v487_v28 = vand.u32 2147483648, %v475_v57  ;;  %vm481_vm3 = vweird.f32 %v475_v57 }
  0xc1   :  { %v488_v43 = vor.u32 1.1754944e-38, %v487_v28 }
  0xc5   :  { %v153_v58 = vpop.f32.mrf.mxu0  ;;  %v1398_v63 = vpop.eup %1397 }
  0xc6   :  { %v1842_v59 = vadd.f32 %v153_v58, %v72_v33  ;;  %v477_v4 = vmul.f32 %v1398_v63, %v475_v57  ;;  %vm482_vm2 = vweird.f32 %v1398_v63 }
  0xc7   :  { %vm483_vm4 = vmor %vm481_vm3, %vm482_vm2 }
  0xc8   :  { %2072 = vst [vmem:[#allocation12_spill] sm:$0xff] %v1842_v59  ;;  %v478_v13 = vsub.f32 1.0, %v477_v4 }
  0xca   :  { %v479_v18 = vmul.f32 %v1398_v63, %v478_v13 }
  0xcc   :  { %v480_v24 = vadd.f32 %v1398_v63, %v479_v18 }
  0xcd   :  { %v156_v2 = vpop.f32.mrf.mxu0 }
  0xce   :  { %v1847_v7 = vadd.f32 %v156_v2, %v72_v33  ;;  %v485_v33 = vand.u32 2147483647, %v475_v57  ;;  %v484_v34 = vsel %vm483_vm4, %v1398_v63, %v480_v24  ;;  %v179_v24 = vpop.f32.mrf.mxu1 }
  0xd0   :  { %2073 = vst [vmem:[#allocation13_spill] sm:$0xff] %v1847_v7  ;;  %vm486_vm5 = vcmp.eq.f32.partialorder %v485_v33, 8.507059e+37 }
  0xd1   :  { %v454_v9 = vpop.f32.mrf.mxu3  ;;  %v489_v48 = vsel %vm486_vm5, %v488_v43, %v484_v34 }
  0xd2   :  { %v491_v10 = vadd.f32 %v454_v9, %v177_v1 }
  0xd4   :  { %v1346_v14 = vmul.f32 -1.442695, %v491_v10 }
  0xd5   :  { %v467_v16 = vpop.f32.mrf.mxu0 }
  0xd6   :  { %1399 = vpow2.f32 %v1346_v14  ;;  %v511_v38 = vadd.f32 %v1852_v23, %v467_v16  ;;  %v1886_v28 = vpop.f32.mrf.mxu1 }
  0xd8   :  { %v512_v49 = vmul.f32 %v511_v38, %v489_v48 }
  0xd9   :  { %v456_v20 = vpop.f32.mrf.mxu3 }
  0xda   :  { %v513_v58 = vadd.f32 %v512_v49, %v218_v51 }
  0xdc   :  { %v1400_v26 = vpop.eup %1399 }
  0xdd   :  { %v495_v30 = vadd.f32 1.0, %v1400_v26  ;;  %v469_v42 = vpop.f32.mrf.mxu0  ;;  %v220_v26 = vpop.f32.mrf.mxu2 }
  0xde   :  { %v1890_v33 = vpop.f32.mrf.mxu1 }
  0xdf   :  { %1401 = vrcp.f32 %v495_v30  ;;  %v507_v57 = vand.u32 2147483648, %v495_v30  ;;  %v505_v63 = vand.u32 2147483647, %v495_v30  ;;  %vm501_vm7 = vweird.f32 %v495_v30 }
  0xe0   :  { %1403 = vtanh.f32 %v513_v58 }
  0xe1   :  { %v508_v31 = vor.u32 1.1754944e-38, %v507_v57  ;;  %vm506_vm9 = vcmp.eq.f32.partialorder %v505_v63, 8.507059e+37  ;;  %v180_v57 = vadd.f32 %v179_v24, %v1844_v60 }
  0xe5   :  { %v1402_v53 = vpop.eup %1401 }
  0xe6   :  { %v497_v55 = vmul.f32 %v1402_v53, %v495_v30  ;;  %vm502_vm6 = vweird.f32 %v1402_v53  ;;  %v1404_v13 = vpop.eup %1403  ;;  %v1888_v30 = vpop.f32.mrf.mxu2 }
  0xe7   :  { %vm503_vm8 = vmor %vm501_vm7, %vm502_vm6  ;;  %v1894_v38 = vpop.f32.mrf.mxu1 }
  0xe8   :  { %v498_v62 = vsub.f32 1.0, %v497_v55 }
  0xea   :  { %v499_v1 = vmul.f32 %v1402_v53, %v498_v62 }
  0xec   :  { %v500_v2 = vadd.f32 %v1402_v53, %v499_v1 }
  0xee   :  { %v504_v4 = vsel %vm503_vm8, %v1402_v53, %v500_v2  ;;  %v1892_v34 = vpop.f32.mrf.mxu2 }
  0xef   :  { %v509_v9 = vsel %vm506_vm9, %v508_v31, %v504_v4  ;;  %v1898_v43 = vpop.f32.mrf.mxu1 }
  0xf0   :  { %v515_v10 = vsub.f32 1.0, %v509_v9  ;;  %v517_v16 = vmul.f32 0.0, %v509_v9 }
  0xf2   :  { %v516_v14 = vmul.f32 %v1404_v13, %v515_v10 }
  0xf4   :  { %v1858_v18 = vadd.f32 %v517_v16, %v516_v14 }
  0xf6   :  { %v523_v20 = vpack.c.bf16 %v1858_v18, %v1858_v18  ;;  %v1896_v42 = vpop.f32.mrf.mxu2 }
  0xf7   :  { %v1902_v48 = vpop.f32.mrf.mxu1 }
  0xf8   :  { %532 = vmatmul.bf16.vlgmr.msrb.gmra.mxu1 %v523_v20  ;;  %545 = vmatmul.bf16.vlgmr.msrb.gmra.mxu2 %v523_v20 }
  0xf9   :  { %558 = vmatmul.bf16.vlgmr.msra.gmra.mxu3 %v523_v20  ;;  %734 = vmatpush.bf16.msrb.mxu1 %v1624_v15 }
  0xfa   :  { %800 = vmatpush.bf16.msrb.mxu2 %v1608_v3  ;;  %813 = vmatpush.bf16.msra.mxu3 %v1670_v46 }
  0xfd   :  { %735 = vmatpush.bf16.msrb.mxu1 %v1633_v22 }
  0xfe   :  { %801 = vmatpush.bf16.msrb.mxu2 %v1614_v6  ;;  %814 = vmatpush.bf16.msra.mxu3 %v1685_v54  ;;  %v1900_v47 = vpop.f32.mrf.mxu2 }
  0xff   :  { %v1906_v51 = vpop.f32.mrf.mxu1 }
 0x100   :  { %2075 = vst [vmem:[#allocation15_spill] sm:$0xff] %v1906_v51 }
 0x101   :  { %736 = vmatpush.bf16.msrb.mxu1 %v1644_v29 }
 0x102   :  { %802 = vmatpush.bf16.msrb.mxu2 %v1622_v12  ;;  %815 = vmatpush.bf16.msra.mxu3 %v1695_v0 }
 0x105   :  { %737 = vmatpush.bf16.msrb.mxu1 %v1652_v35 }
 0x106   :  { %803 = vmatpush.bf16.msrb.mxu2 %v1630_v19  ;;  %816 = vmatpush.bf16.msra.mxu3 %v1712_v8  ;;  %v1904_v49 = vpop.f32.mrf.mxu2 }
 0x107   :  { %2074 = vst [vmem:[#allocation14_spill] sm:$0xff] %v1904_v49 }
 0x109   :  { %738 = vmatpush.bf16.msrb.mxu1 %v1663_v44 }
 0x10a   :  { %804 = vmatpush.bf16.msrb.mxu2 %v1636_v25  ;;  %817 = vmatpush.bf16.msra.mxu3 %v1721_v11 }
 0x10d   :  { %739 = vmatpush.bf16.msrb.mxu1 %v1676_v52 }
 0x10e   :  { %805 = vmatpush.bf16.msrb.mxu2 %v1649_v32  ;;  %818 = vmatpush.bf16.msra.mxu3 %v1734_v17  ;;  %v1908_v53 = vpop.f32.mrf.mxu2 }
 0x10f   :  { %2076 = vst [vmem:[#allocation16_spill] sm:$0xff] %v1908_v53 }
 0x111   :  { %740 = vmatpush.bf16.msrb.mxu1 %v1689_v61 }
 0x112   :  { %806 = vmatpush.bf16.msrb.mxu2 %v1660_v37  ;;  %819 = vmatpush.bf16.msra.mxu3 %v1741_v21 }
 0x115   :  { %741 = vmatpush.bf16.msrb.mxu1 %v1700_v5 }
 0x116   :  { %807 = vmatpush.bf16.msrb.mxu2 %v1668_v45  ;;  %820 = vmatpush.bf16.msra.mxu3 %v1754_v27 }
 0x175   :  { %v533_v55 = vpop.f32.mrf.mxu1 }
 0x176   :  { %v563_v58 = vadd.f32 %v533_v55, %v1832_v36 }
 0x178   :  { %v1347_v62 = vmul.f32 -1.442695, %v563_v58 }
 0x17a   :  { %1405 = vpow2.f32 %v1347_v62 }
 0x17b   :  { %v546_v1 = vpop.f32.mrf.mxu2 }
 0x17c   :  { %v583_v63 = vadd.f32 %v546_v1, %v180_v57  ;;  %v559_v2 = vpop.f32.mrf.mxu3 }
 0x17d   :  { %v535_v31 = vpop.f32.mrf.mxu1 }
 0x17e   :  { %v1348_v4 = vmul.f32 -1.442695, %v583_v63 }
 0x180   :  { %v1406_v9 = vpop.eup %1405  ;;  %1407 = vpow2.f32 %v1348_v4 }
 0x181   :  { %v567_v10 = vadd.f32 1.0, %v1406_v9 }
 0x183   :  { %1409 = vrcp.f32 %v567_v10  ;;  %v548_v13 = vpop.f32.mrf.mxu2  ;;  %v579_v58 = vand.u32 2147483648, %v567_v10  ;;  %v577_v62 = vand.u32 2147483647, %v567_v10  ;;  %vm573_vm11 = vweird.f32 %v567_v10 }
 0x184   :  { %v561_v14 = vpop.f32.mrf.mxu3  ;;  %v603_v13 = vadd.f32 %v1852_v23, %v559_v2 }
 0x185   :  { %v580_v63 = vor.u32 1.1754944e-38, %v579_v58  ;;  %vm578_vm13 = vcmp.eq.f32.partialorder %v577_v62, 8.507059e+37  ;;  %v221_v14 = vadd.f32 %v220_v26, %v1855_v40 }
 0x186   :  { %v1408_v16 = vpop.eup %1407 }
 0x187   :  { %v587_v20 = vadd.f32 1.0, %v1408_v16 }
 0x189   :  { %v1410_v53 = vpop.eup %1409  ;;  %1411 = vrcp.f32 %v587_v20  ;;  %v597_v51 = vand.u32 2147483647, %v587_v20  ;;  %vm593_vm15 = vweird.f32 %v587_v20 }
 0x18a   :  { %v569_v36 = vmul.f32 %v1410_v53, %v567_v10  ;;  %vm574_vm10 = vweird.f32 %v1410_v53 }
 0x18b   :  { %vm575_vm12 = vmor %vm573_vm11, %vm574_vm10  ;;  %vm598_vm1 = vcmp.eq.f32.partialorder %v597_v51, 8.507059e+37 }
 0x18c   :  { %v570_v55 = vsub.f32 1.0, %v569_v36  ;;  %v599_v36 = vand.u32 2147483648, %v587_v20 }
 0x18e   :  { %v571_v24 = vmul.f32 %v1410_v53, %v570_v55  ;;  %v600_v10 = vor.u32 1.1754944e-38, %v599_v36 }
 0x18f   :  { %v1412_v57 = vpop.eup %1411 }
 0x190   :  { %v589_v1 = vmul.f32 %v1412_v57, %v587_v20  ;;  %v572_v31 = vadd.f32 %v1410_v53, %v571_v24  ;;  %vm594_vm14 = vweird.f32 %v1412_v57 }
 0x191   :  { %vm595_vm0 = vmor %vm593_vm15, %vm594_vm14 }
 0x192   :  { %v590_v4 = vsub.f32 1.0, %v589_v1  ;;  %v576_v9 = vsel %vm575_vm12, %v1410_v53, %v572_v31 }
 0x193   :  { %v581_v16 = vsel %vm578_vm13, %v580_v63, %v576_v9 }
 0x194   :  { %v591_v7 = vmul.f32 %v1412_v57, %v590_v4  ;;  %v604_v55 = vmul.f32 %v603_v13, %v581_v16 }
 0x196   :  { %v605_v49 = vadd.f32 %v604_v55, %v221_v14  ;;  %v592_v59 = vadd.f32 %v1412_v57, %v591_v7 }
 0x198   :  { %1413 = vtanh.f32 %v605_v49  ;;  %v596_v58 = vsel %vm595_vm0, %v1412_v57, %v592_v59  ;;  %v183_v59 = vadd.f32 %v1886_v28, %v1844_v60 }
 0x199   :  { %v601_v53 = vsel %vm598_vm1, %v600_v10, %v596_v58 }
 0x19a   :  { %v607_v24 = vsub.f32 1.0, %v601_v53  ;;  %v609_v26 = vmul.f32 %v601_v53, %v1858_v18 }
 0x19e   :  { %v1414_v62 = vpop.eup %1413 }
 0x19f   :  { %v608_v2 = vmul.f32 %v1414_v62, %v607_v24 }
 0x1a1   :  { %v1915_v1 = vadd.f32 %v609_v26, %v608_v2 }
 0x1a3   :  { %v615_v31 = vpack.c.bf16 %v1915_v1, %v1915_v1 }
 0x1a5   :  { %624 = vmatmul.bf16.vlgmr.msra.gmra.mxu0 %v615_v31  ;;  %637 = vmatmul.bf16.vlgmr.msra.gmra.mxu1 %v615_v31 }
 0x1a6   :  { %650 = vmatmul.bf16.vlgmr.msra.gmra.mxu2 %v615_v31  ;;  %826 = vmatpush.bf16.msra.mxu0 %v1624_v15 }
 0x1a7   :  { %892 = vmatpush.bf16.msra.mxu1 %v1608_v3  ;;  %905 = vmatpush.bf16.msra.mxu2 %v1670_v46 }
 0x1aa   :  { %827 = vmatpush.bf16.msra.mxu0 %v1633_v22 }
 0x1ab   :  { %893 = vmatpush.bf16.msra.mxu1 %v1614_v6  ;;  %906 = vmatpush.bf16.msra.mxu2 %v1685_v54 }
 0x1ae   :  { %828 = vmatpush.bf16.msra.mxu0 %v1644_v29 }
 0x1af   :  { %894 = vmatpush.bf16.msra.mxu1 %v1622_v12  ;;  %907 = vmatpush.bf16.msra.mxu2 %v1695_v0 }
 0x1b2   :  { %829 = vmatpush.bf16.msra.mxu0 %v1652_v35 }
 0x1b3   :  { %895 = vmatpush.bf16.msra.mxu1 %v1630_v19  ;;  %908 = vmatpush.bf16.msra.mxu2 %v1712_v8 }
 0x1b6   :  { %830 = vmatpush.bf16.msra.mxu0 %v1663_v44 }
 0x1b7   :  { %896 = vmatpush.bf16.msra.mxu1 %v1636_v25  ;;  %909 = vmatpush.bf16.msra.mxu2 %v1721_v11 }
 0x1ba   :  { %831 = vmatpush.bf16.msra.mxu0 %v1676_v52 }
 0x1bb   :  { %897 = vmatpush.bf16.msra.mxu1 %v1649_v32  ;;  %910 = vmatpush.bf16.msra.mxu2 %v1734_v17 }
 0x1be   :  { %832 = vmatpush.bf16.msra.mxu0 %v1689_v61 }
 0x1bf   :  { %898 = vmatpush.bf16.msra.mxu1 %v1660_v37  ;;  %911 = vmatpush.bf16.msra.mxu2 %v1741_v21 }
 0x1c2   :  { %833 = vmatpush.bf16.msra.mxu0 %v1700_v5 }
 0x1c3   :  { %899 = vmatpush.bf16.msra.mxu1 %v1668_v45  ;;  %912 = vmatpush.bf16.msra.mxu2 %v1754_v27 }
 0x222   :  { %v625_v7 = vpop.f32.mrf.mxu0  ;;  %v638_v18 = vpop.f32.mrf.mxu1 }
 0x223   :  { %v655_v49 = vadd.f32 %v625_v7, %v1834_v39  ;;  %v675_v51 = vadd.f32 %v638_v18, %v183_v59 }
 0x225   :  { %v1349_v20 = vmul.f32 -1.442695, %v655_v49  ;;  %v1350_v57 = vmul.f32 -1.442695, %v675_v51 }
 0x227   :  { %1415 = vpow2.f32 %v1349_v20 }
 0x228   :  { %1417 = vpow2.f32 %v1350_v57  ;;  %v224_v57 = vadd.f32 %v1888_v30, %v1855_v40 }
 0x229   :  { %v651_v63 = vpop.f32.mrf.mxu2 }
 0x22a   :  { %v627_v4 = vpop.f32.mrf.mxu0  ;;  %v640_v9 = vpop.f32.mrf.mxu1  ;;  %v695_v49 = vadd.f32 %v1852_v23, %v651_v63 }
 0x22d   :  { %v1416_v13 = vpop.eup %1415 }
 0x22e   :  { %v1418_v14 = vpop.eup %1417  ;;  %v659_v16 = vadd.f32 1.0, %v1416_v13 }
 0x22f   :  { %v679_v36 = vadd.f32 1.0, %v1418_v14 }
 0x230   :  { %1419 = vrcp.f32 %v659_v16  ;;  %v671_v62 = vand.u32 2147483648, %v659_v16  ;;  %v669_v26 = vand.u32 2147483647, %v659_v16  ;;  %vm665_vm3 = vweird.f32 %v659_v16 }
 0x231   :  { %1421 = vrcp.f32 %v679_v36  ;;  %v653_v55 = vpop.f32.mrf.mxu2  ;;  %v691_v4 = vand.u32 2147483648, %v679_v36  ;;  %vm685_vm7 = vweird.f32 %v679_v36  ;;  %v689_v13 = vand.u32 2147483647, %v679_v36 }
 0x232   :  { %v672_v7 = vor.u32 1.1754944e-38, %v671_v62  ;;  %vm670_vm5 = vcmp.eq.f32.partialorder %v669_v26, 8.507059e+37 }
 0x233   :  { %vm690_vm9 = vcmp.eq.f32.partialorder %v689_v13, 8.507059e+37 }
 0x236   :  { %v1420_v28 = vpop.eup %1419 }
 0x237   :  { %v1422_v10 = vpop.eup %1421  ;;  %v661_v58 = vmul.f32 %v1420_v28, %v659_v16  ;;  %vm666_vm2 = vweird.f32 %v1420_v28  ;;  %v692_v16 = vor.u32 1.1754944e-38, %v691_v4 }
 0x238   :  { %v681_v53 = vmul.f32 %v1422_v10, %v679_v36  ;;  %vm667_vm4 = vmor %vm665_vm3, %vm666_vm2  ;;  %vm686_vm6 = vweird.f32 %v1422_v10 }
 0x239   :  { %v662_v39 = vsub.f32 1.0, %v661_v58  ;;  %vm687_vm8 = vmor %vm685_vm7, %vm686_vm6 }
 0x23a   :  { %v682_v24 = vsub.f32 1.0, %v681_v53 }
 0x23b   :  { %v663_v2 = vmul.f32 %v1420_v28, %v662_v39 }
 0x23c   :  { %v683_v31 = vmul.f32 %v1422_v10, %v682_v24 }
 0x23d   :  { %v664_v59 = vadd.f32 %v1420_v28, %v663_v2 }
 0x23e   :  { %v684_v20 = vadd.f32 %v1422_v10, %v683_v31 }
 0x23f   :  { %v668_v18 = vsel %vm667_vm4, %v1420_v28, %v664_v59 }
 0x240   :  { %v673_v51 = vsel %vm670_vm5, %v672_v7, %v668_v18  ;;  %v688_v55 = vsel %vm687_vm8, %v1422_v10, %v684_v20 }
 0x241   :  { %v696_v9 = vmul.f32 %v695_v49, %v673_v51  ;;  %v693_v28 = vsel %vm690_vm9, %v692_v16, %v688_v55 }
 0x242   :  { %v699_v58 = vsub.f32 1.0, %v693_v28  ;;  %v701_v39 = vmul.f32 %v693_v28, %v1915_v1  ;;  %v186_v1 = vadd.f32 %v1890_v33, %v1844_v60 }
 0x243   :  { %v697_v14 = vadd.f32 %v696_v9, %v224_v57 }
 0x245   :  { %1423 = vtanh.f32 %v697_v14 }
 0x24b   :  { %v1424_v53 = vpop.eup %1423 }
 0x24c   :  { %v700_v63 = vmul.f32 %v1424_v53, %v699_v58 }
 0x24e   :  { %v1950_v24 = vadd.f32 %v701_v39, %v700_v63 }
 0x250   :  { %v707_v30 = vpack.c.bf16 %v1950_v24, %v1950_v24 }
 0x252   :  { %716 = vmatmul.bf16.vlgmr.msrb.gmra.mxu3 %v707_v30  ;;  %729 = vmatmul.bf16.vlgmr.msrb.gmra.mxu0 %v707_v30 }
 0x253   :  { %742 = vmatmul.bf16.vlgmr.msrb.gmra.mxu1 %v707_v30  ;;  %918 = vmatpush.bf16.msrb.mxu3 %v1624_v15 }
 0x254   :  { %984 = vmatpush.bf16.msrb.mxu0 %v1608_v3  ;;  %997 = vmatpush.bf16.msrb.mxu1 %v1670_v46 }
 0x257   :  { %919 = vmatpush.bf16.msrb.mxu3 %v1633_v22 }
 0x258   :  { %985 = vmatpush.bf16.msrb.mxu0 %v1614_v6  ;;  %998 = vmatpush.bf16.msrb.mxu1 %v1685_v54 }
 0x25b   :  { %920 = vmatpush.bf16.msrb.mxu3 %v1644_v29 }
 0x25c   :  { %986 = vmatpush.bf16.msrb.mxu0 %v1622_v12  ;;  %999 = vmatpush.bf16.msrb.mxu1 %v1695_v0 }
 0x25f   :  { %921 = vmatpush.bf16.msrb.mxu3 %v1652_v35 }
 0x260   :  { %987 = vmatpush.bf16.msrb.mxu0 %v1630_v19  ;;  %1000 = vmatpush.bf16.msrb.mxu1 %v1712_v8 }
 0x263   :  { %922 = vmatpush.bf16.msrb.mxu3 %v1663_v44 }
 0x264   :  { %988 = vmatpush.bf16.msrb.mxu0 %v1636_v25  ;;  %1001 = vmatpush.bf16.msrb.mxu1 %v1721_v11 }
 0x267   :  { %923 = vmatpush.bf16.msrb.mxu3 %v1676_v52 }
 0x268   :  { %989 = vmatpush.bf16.msrb.mxu0 %v1649_v32  ;;  %1002 = vmatpush.bf16.msrb.mxu1 %v1734_v17 }
 0x26b   :  { %924 = vmatpush.bf16.msrb.mxu3 %v1689_v61 }
 0x26c   :  { %990 = vmatpush.bf16.msrb.mxu0 %v1660_v37  ;;  %1003 = vmatpush.bf16.msrb.mxu1 %v1741_v21 }
 0x26f   :  { %925 = vmatpush.bf16.msrb.mxu3 %v1700_v5 }
 0x270   :  { %991 = vmatpush.bf16.msrb.mxu0 %v1668_v45  ;;  %1004 = vmatpush.bf16.msrb.mxu1 %v1754_v27 }
 0x2cf   :  { %v730_v36 = vpop.f32.mrf.mxu0 }
 0x2d0   :  { %v767_v10 = vadd.f32 %v730_v36, %v186_v1  ;;  %v743_v62 = vpop.f32.mrf.mxu1 }
 0x2d1   :  { %v787_v30 = vadd.f32 %v1852_v23, %v743_v62 }
 0x2d2   :  { %v1352_v2 = vmul.f32 -1.442695, %v767_v10 }
 0x2d4   :  { %1425 = vpow2.f32 %v1352_v2  ;;  %v227_v2 = vadd.f32 %v1892_v34, %v1855_v40 }
 0x2d5   :  { %v717_v26 = vpop.f32.mrf.mxu3 }
 0x2d6   :  { %v747_v31 = vadd.f32 %v717_v26, %v1836_v41 }
 0x2d7   :  { %v732_v59 = vpop.f32.mrf.mxu0 }
 0x2d8   :  { %v1351_v7 = vmul.f32 -1.442695, %v747_v31  ;;  %v745_v18 = vpop.f32.mrf.mxu1 }
 0x2da   :  { %v1426_v49 = vpop.eup %1425  ;;  %1427 = vpow2.f32 %v1351_v7 }
 0x2db   :  { %v771_v51 = vadd.f32 1.0, %v1426_v49 }
 0x2dd   :  { %v719_v20 = vpop.f32.mrf.mxu3  ;;  %1429 = vrcp.f32 %v771_v51  ;;  %v783_v26 = vand.u32 2147483648, %v771_v51  ;;  %vm777_vm15 = vweird.f32 %v771_v51  ;;  %v781_v59 = vand.u32 2147483647, %v771_v51 }
 0x2df   :  { %v784_v49 = vor.u32 1.1754944e-38, %v783_v26  ;;  %vm782_vm1 = vcmp.eq.f32.partialorder %v781_v59, 8.507059e+37 }
 0x2e0   :  { %v1428_v57 = vpop.eup %1427 }
 0x2e1   :  { %v751_v4 = vadd.f32 1.0, %v1428_v57 }
 0x2e3   :  { %1431 = vrcp.f32 %v751_v4  ;;  %v1430_v33 = vpop.eup %1429  ;;  %v763_v28 = vand.u32 2147483648, %v751_v4  ;;  %v761_v41 = vand.u32 2147483647, %v751_v4  ;;  %vm757_vm11 = vweird.f32 %v751_v4 }
 0x2e4   :  { %v773_v9 = vmul.f32 %v1430_v33, %v771_v51  ;;  %vm778_vm14 = vweird.f32 %v1430_v33 }
 0x2e5   :  { %v764_v39 = vor.u32 1.1754944e-38, %v763_v28  ;;  %vm762_vm13 = vcmp.eq.f32.partialorder %v761_v41, 8.507059e+37  ;;  %vm779_vm0 = vmor %vm777_vm15, %vm778_vm14 }
 0x2e6   :  { %v774_v55 = vsub.f32 1.0, %v773_v9 }
 0x2e8   :  { %v775_v53 = vmul.f32 %v1430_v33, %v774_v55 }
 0x2e9   :  { %v1432_v13 = vpop.eup %1431 }
 0x2ea   :  { %v753_v14 = vmul.f32 %v1432_v13, %v751_v4  ;;  %vm758_vm10 = vweird.f32 %v1432_v13  ;;  %v776_v10 = vadd.f32 %v1430_v33, %v775_v53 }
 0x2eb   :  { %vm759_vm12 = vmor %vm757_vm11, %vm758_vm10 }
 0x2ec   :  { %v754_v16 = vsub.f32 1.0, %v753_v14  ;;  %v780_v18 = vsel %vm779_vm0, %v1430_v33, %v776_v10 }
 0x2ed   :  { %v785_v20 = vsel %vm782_vm1, %v784_v49, %v780_v18 }
 0x2ee   :  { %v755_v58 = vmul.f32 %v1432_v13, %v754_v16  ;;  %v791_v62 = vsub.f32 1.0, %v785_v20  ;;  %v793_v9 = vmul.f32 %v785_v20, %v1950_v24 }
 0x2f0   :  { %v756_v63 = vadd.f32 %v1432_v13, %v755_v58 }
 0x2f2   :  { %v760_v1 = vsel %vm759_vm12, %v1432_v13, %v756_v63 }
 0x2f3   :  { %v765_v36 = vsel %vm762_vm13, %v764_v39, %v760_v1  ;;  %v230_v1 = vadd.f32 %v1896_v42, %v1855_v40 }
 0x2f4   :  { %v788_v31 = vmul.f32 %v787_v30, %v765_v36 }
 0x2f6   :  { %v789_v7 = vadd.f32 %v788_v31, %v227_v2 }
 0x2f8   :  { %1433 = vtanh.f32 %v789_v7 }
 0x2fe   :  { %v1434_v57 = vpop.eup %1433 }
 0x2ff   :  { %v792_v4 = vmul.f32 %v1434_v57, %v791_v62 }
 0x301   :  { %v1985_v13 = vadd.f32 %v793_v9, %v792_v4 }
 0x303   :  { %v799_v34 = vpack.c.bf16 %v1985_v13, %v1985_v13 }
 0x305   :  { %808 = vmatmul.bf16.vlgmr.msrb.gmra.mxu2 %v799_v34  ;;  %821 = vmatmul.bf16.vlgmr.msra.gmra.mxu3 %v799_v34 }
 0x306   :  { %834 = vmatmul.bf16.vlgmr.msra.gmra.mxu0 %v799_v34  ;;  %1010 = vmatpush.bf16.msrb.mxu2 %v1624_v15 }
 0x307   :  { %1076 = vmatpush.bf16.msra.mxu3 %v1608_v3  ;;  %1089 = vmatpush.bf16.msra.mxu0 %v1670_v46 }
 0x30a   :  { %1011 = vmatpush.bf16.msrb.mxu2 %v1633_v22 }
 0x30b   :  { %1077 = vmatpush.bf16.msra.mxu3 %v1614_v6  ;;  %1090 = vmatpush.bf16.msra.mxu0 %v1685_v54  ;;  %v189_v6 = vadd.f32 %v1894_v38, %v1844_v60 }
 0x30e   :  { %1012 = vmatpush.bf16.msrb.mxu2 %v1644_v29 }
 0x30f   :  { %1078 = vmatpush.bf16.msra.mxu3 %v1622_v12  ;;  %1091 = vmatpush.bf16.msra.mxu0 %v1695_v0 }
 0x312   :  { %1013 = vmatpush.bf16.msrb.mxu2 %v1652_v35 }
 0x313   :  { %1079 = vmatpush.bf16.msra.mxu3 %v1630_v19  ;;  %1092 = vmatpush.bf16.msra.mxu0 %v1712_v8 }
 0x316   :  { %1014 = vmatpush.bf16.msrb.mxu2 %v1663_v44 }
 0x317   :  { %1080 = vmatpush.bf16.msra.mxu3 %v1636_v25  ;;  %1093 = vmatpush.bf16.msra.mxu0 %v1721_v11 }
 0x31a   :  { %1015 = vmatpush.bf16.msrb.mxu2 %v1676_v52 }
 0x31b   :  { %1081 = vmatpush.bf16.msra.mxu3 %v1649_v32  ;;  %1094 = vmatpush.bf16.msra.mxu0 %v1734_v17 }
 0x31e   :  { %1016 = vmatpush.bf16.msrb.mxu2 %v1689_v61 }
 0x31f   :  { %1082 = vmatpush.bf16.msra.mxu3 %v1660_v37  ;;  %1095 = vmatpush.bf16.msra.mxu0 %v1741_v21 }
 0x322   :  { %1017 = vmatpush.bf16.msrb.mxu2 %v1700_v5 }
 0x323   :  { %1083 = vmatpush.bf16.msra.mxu3 %v1668_v45  ;;  %1096 = vmatpush.bf16.msra.mxu0 %v1754_v27 }
 0x383   :  { %v835_v3 = vpop.f32.mrf.mxu0 }
 0x384   :  { %v879_v53 = vadd.f32 %v1852_v23, %v835_v3 }
 0x388   :  { %v809_v12 = vpop.f32.mrf.mxu2  ;;  %v822_v19 = vpop.f32.mrf.mxu3 }
 0x389   :  { %v839_v25 = vadd.f32 %v809_v12, %v1838_v50  ;;  %v859_v32 = vadd.f32 %v822_v19, %v189_v6 }
 0x38b   :  { %v1353_v46 = vmul.f32 -1.442695, %v839_v25  ;;  %v1354_v54 = vmul.f32 -1.442695, %v859_v32  ;;  %v837_v37 = vpop.f32.mrf.mxu0 }
 0x38d   :  { %1435 = vpow2.f32 %v1353_v46 }
 0x38e   :  { %1437 = vpow2.f32 %v1354_v54 }
 0x390   :  { %v811_v0 = vpop.f32.mrf.mxu2  ;;  %v824_v8 = vpop.f32.mrf.mxu3 }
 0x393   :  { %v1436_v11 = vpop.eup %1435 }
 0x394   :  { %v1438_v45 = vpop.eup %1437  ;;  %v843_v17 = vadd.f32 1.0, %v1436_v11 }
 0x395   :  { %v863_v21 = vadd.f32 1.0, %v1438_v45 }
 0x396   :  { %1439 = vrcp.f32 %v843_v17  ;;  %v855_v50 = vand.u32 2147483648, %v843_v17  ;;  %v853_v16 = vand.u32 2147483647, %v843_v17  ;;  %vm849_vm3 = vweird.f32 %v843_v17 }
 0x397   :  { %1441 = vrcp.f32 %v863_v21  ;;  %v875_v10 = vand.u32 2147483648, %v863_v21  ;;  %vm869_vm7 = vweird.f32 %v863_v21  ;;  %v873_v2 = vand.u32 2147483647, %v863_v21 }
 0x398   :  { %v856_v41 = vor.u32 1.1754944e-38, %v855_v50  ;;  %vm854_vm5 = vcmp.eq.f32.partialorder %v853_v16, 8.507059e+37 }
 0x399   :  { %v876_v59 = vor.u32 1.1754944e-38, %v875_v10  ;;  %vm874_vm9 = vcmp.eq.f32.partialorder %v873_v2, 8.507059e+37  ;;  %v2077_v10 = vld [vmem:[#allocation12_spill] sm:$0xff] }
 0x39c   :  { %v1440_v27 = vpop.eup %1439 }
 0x39d   :  { %v1442_v38 = vpop.eup %1441  ;;  %v845_v24 = vmul.f32 %v1440_v27, %v843_v17  ;;  %vm850_vm2 = vweird.f32 %v1440_v27 }
 0x39e   :  { %v865_v51 = vmul.f32 %v1442_v38, %v863_v21  ;;  %vm851_vm4 = vmor %vm849_vm3, %vm850_vm2  ;;  %vm870_vm6 = vweird.f32 %v1442_v38  ;;  %v233_v21 = vadd.f32 %v1900_v47, %v1855_v40 }
 0x39f   :  { %v846_v33 = vsub.f32 1.0, %v845_v24  ;;  %vm871_vm8 = vmor %vm869_vm7, %vm870_vm6 }
 0x3a0   :  { %v866_v14 = vsub.f32 1.0, %v865_v51 }
 0x3a1   :  { %v847_v55 = vmul.f32 %v1440_v27, %v846_v33 }
 0x3a2   :  { %v867_v28 = vmul.f32 %v1442_v38, %v866_v14 }
 0x3a3   :  { %v848_v58 = vadd.f32 %v1440_v27, %v847_v55 }
 0x3a4   :  { %v868_v30 = vadd.f32 %v1442_v38, %v867_v28 }
 0x3a5   :  { %v852_v63 = vsel %vm851_vm4, %v1440_v27, %v848_v58 }
 0x3a6   :  { %v857_v39 = vsel %vm854_vm5, %v856_v41, %v852_v63  ;;  %v872_v31 = vsel %vm871_vm8, %v1442_v38, %v868_v30  ;;  %v195_v30 = vadd.f32 %v1902_v48, %v1844_v60 }
 0x3a7   :  { %v880_v36 = vmul.f32 %v879_v53, %v857_v39  ;;  %v877_v7 = vsel %vm874_vm9, %v876_v59, %v872_v31 }
 0x3a8   :  { %v883_v18 = vsub.f32 1.0, %v877_v7  ;;  %v885_v62 = vmul.f32 %v877_v7, %v1985_v13 }
 0x3a9   :  { %v881_v26 = vadd.f32 %v880_v36, %v230_v1 }
 0x3ab   :  { %1443 = vtanh.f32 %v881_v26 }
 0x3b1   :  { %v1444_v49 = vpop.eup %1443 }
 0x3b2   :  { %v884_v20 = vmul.f32 %v1444_v49, %v883_v18 }
 0x3b4   :  { %v2020_v57 = vadd.f32 %v885_v62, %v884_v20 }
 0x3b6   :  { %v891_v42 = vpack.c.bf16 %v2020_v57, %v2020_v57 }
 0x3b8   :  { %900 = vmatmul.bf16.vlgmr.msra.gmra.mxu1 %v891_v42  ;;  %913 = vmatmul.bf16.vlgmr.msra.gmra.mxu2 %v891_v42 }
 0x3b9   :  { %926 = vmatmul.bf16.vlgmr.msrb.gmra.mxu3 %v891_v42  ;;  %1102 = vmatpush.bf16.msra.mxu1 %v1624_v15  ;;  %v192_v15 = vadd.f32 %v1898_v43, %v1844_v60 }
 0x3bd   :  { %1103 = vmatpush.bf16.msra.mxu1 %v1633_v22 }
 0x3c1   :  { %1104 = vmatpush.bf16.msra.mxu1 %v1644_v29 }
 0x3c5   :  { %1105 = vmatpush.bf16.msra.mxu1 %v1652_v35 }
 0x3c9   :  { %1106 = vmatpush.bf16.msra.mxu1 %v1663_v44 }
 0x3cd   :  { %1107 = vmatpush.bf16.msra.mxu1 %v1676_v52 }
 0x3d1   :  { %1108 = vmatpush.bf16.msra.mxu1 %v1689_v61 }
 0x3d5   :  { %1109 = vmatpush.bf16.msra.mxu1 %v1700_v5 }
 0x435   :  { %v901_v4 = vpop.f32.mrf.mxu1 }
 0x436   :  { %v931_v9 = vadd.f32 %v901_v4, %v1840_v56 }
 0x438   :  { %v1355_v13 = vmul.f32 -1.442695, %v931_v9 }
 0x43a   :  { %1445 = vpow2.f32 %v1355_v13 }
 0x43b   :  { %v914_v22 = vpop.f32.mrf.mxu2 }
 0x43c   :  { %v951_v29 = vadd.f32 %v914_v22, %v192_v15  ;;  %v927_v34 = vpop.f32.mrf.mxu3 }
 0x43d   :  { %v903_v35 = vpop.f32.mrf.mxu1  ;;  %v971_v17 = vadd.f32 %v1852_v23, %v927_v34 }
 0x43e   :  { %v1356_v3 = vmul.f32 -1.442695, %v951_v29 }
 0x440   :  { %v1446_v44 = vpop.eup %1445  ;;  %1447 = vpow2.f32 %v1356_v3 }
 0x441   :  { %v935_v52 = vadd.f32 1.0, %v1446_v44 }
 0x443   :  { %1449 = vrcp.f32 %v935_v52  ;;  %v916_v61 = vpop.f32.mrf.mxu2  ;;  %v947_v32 = vand.u32 2147483648, %v935_v52  ;;  %v945_v46 = vand.u32 2147483647, %v935_v52  ;;  %vm941_vm11 = vweird.f32 %v935_v52 }
 0x444   :  { %v929_v6 = vpop.f32.mrf.mxu3 }
 0x445   :  { %v948_v8 = vor.u32 1.1754944e-38, %v947_v32  ;;  %vm946_vm13 = vcmp.eq.f32.partialorder %v945_v46, 8.507059e+37 }
 0x446   :  { %v1448_v5 = vpop.eup %1447 }
 0x447   :  { %v955_v12 = vadd.f32 1.0, %v1448_v5 }
 0x449   :  { %v1450_v19 = vpop.eup %1449  ;;  %1451 = vrcp.f32 %v955_v12  ;;  %v967_v24 = vand.u32 2147483648, %v955_v12  ;;  %v965_v33 = vand.u32 2147483647, %v955_v12  ;;  %vm961_vm15 = vweird.f32 %v955_v12 }
 0x44a   :  { %v937_v56 = vmul.f32 %v1450_v19, %v935_v52  ;;  %vm942_vm10 = vweird.f32 %v1450_v19 }
 0x44b   :  { %vm943_vm12 = vmor %vm941_vm11, %vm942_vm10  ;;  %v968_v55 = vor.u32 1.1754944e-38, %v967_v24  ;;  %vm966_vm1 = vcmp.eq.f32.partialorder %v965_v33, 8.507059e+37  ;;  %v1177_v24 = vld [vmem:[#allocation6 + $0x70] sm:$0xff]  ;;  %v1175_v33 = vld [vmem:[#allocation6 + $0x60] sm:$0xff] }
 0x44c   :  { %v938_v25 = vsub.f32 1.0, %v937_v56  ;;  %v2078_v56 = vld [vmem:[#allocation14_spill] sm:$0xff] }
 0x44e   :  { %v939_v43 = vmul.f32 %v1450_v19, %v938_v25  ;;  %v236_v25 = vadd.f32 %v2078_v56, %v1855_v40 }
 0x44f   :  { %v1452_v54 = vpop.eup %1451 }
 0x450   :  { %v957_v37 = vmul.f32 %v1452_v54, %v955_v12  ;;  %v940_v0 = vadd.f32 %v1450_v19, %v939_v43  ;;  %vm962_vm14 = vweird.f32 %v1452_v54 }
 0x451   :  { %vm963_vm0 = vmor %vm961_vm15, %vm962_vm14 }
 0x452   :  { %v958_v11 = vsub.f32 1.0, %v957_v37  ;;  %v944_v45 = vsel %vm943_vm12, %v1450_v19, %v940_v0 }
 0x453   :  { %v949_v27 = vsel %vm946_vm13, %v948_v8, %v944_v45 }
 0x454   :  { %v959_v38 = vmul.f32 %v1452_v54, %v958_v11  ;;  %v972_v51 = vmul.f32 %v971_v17, %v949_v27 }
 0x456   :  { %v973_v50 = vadd.f32 %v972_v51, %v233_v21  ;;  %v960_v14 = vadd.f32 %v1452_v54, %v959_v38  ;;  %v1178_v38 = vld [vmem:[#allocation6 + $0x78] sm:$0xff]  ;;  %v1176_v51 = vld [vmem:[#allocation6 + $0x68] sm:$0xff] }
 0x457   :  { %1183 = vmatpush.msra.mxu2 %v1178_v38 }
 0x458   :  { %1453 = vtanh.f32 %v973_v50  ;;  %v964_v16 = vsel %vm963_vm0, %v1452_v54, %v960_v14  ;;  %v1174_v50 = vld [vmem:[#allocation6 + $0x58] sm:$0xff]  ;;  %v2079_v14 = vld [vmem:[#allocation15_spill] sm:$0xff] }
 0x459   :  { %v969_v28 = vsel %vm966_vm1, %v968_v55, %v964_v16  ;;  %1184 = vmatpush.msra.mxu2 %v1177_v24  ;;  %v198_v55 = vadd.f32 %v2079_v14, %v1844_v60  ;;  %v1173_v16 = vld [vmem:[#allocation6 + $0x50] sm:$0xff] }
 0x45a   :  { %v975_v58 = vsub.f32 1.0, %v969_v28  ;;  %v977_v47 = vmul.f32 %v969_v28, %v2020_v57 }
 0x45b   :  { %1185 = vmatpush.msra.mxu2 %v1176_v51 }
 0x45d   :  { %1186 = vmatpush.msra.mxu2 %v1175_v33 }
 0x45e   :  { %v1454_v41 = vpop.eup %1453 }
 0x45f   :  { %v976_v53 = vmul.f32 %v1454_v41, %v975_v58  ;;  %1187 = vmatpush.msra.mxu2 %v1174_v50 }
 0x461   :  { %v978_v63 = vadd.f32 %v977_v47, %v976_v53  ;;  %1188 = vmatpush.msra.mxu2 %v1173_v16  ;;  %v1172_v53 = vld [vmem:[#allocation6 + $0x48] sm:$0xff] }
 0x463   :  { %v983_v39 = vpack.c.bf16 %v978_v63, %v978_v63  ;;  %1189 = vmatpush.msra.mxu2 %v1172_v53 }
 0x465   :  { %992 = vmatmul.bf16.vlgmr.msrb.gmra.mxu0 %v983_v39  ;;  %1005 = vmatmul.bf16.vlgmr.msrb.gmra.mxu1 %v983_v39 }
 0x466   :  { %1018 = vmatmul.bf16.vlgmr.msrb.gmra.mxu2 %v983_v39  ;;  %v1170_v39 = vld [vmem:[#allocation6 + $0x38] sm:$0xff] }
 0x4e2   :  { %v993_v1 = vpop.f32.mrf.mxu0  ;;  %v1006_v36 = vpop.f32.mrf.mxu1 }
 0x4e3   :  { %v1023_v2 = vadd.f32 %v993_v1, %v2077_v10  ;;  %v1043_v26 = vadd.f32 %v1006_v36, %v195_v30  ;;  %v1169_v30 = vld [vmem:[#allocation6 + $0x30] sm:$0xff] }
 0x4e4   :  { %v2080_v36 = vld [vmem:[#allocation13_spill] sm:$0xff] }
 0x4e5   :  { %v1357_v31 = vmul.f32 -1.442695, %v1023_v2  ;;  %v1358_v59 = vmul.f32 -1.442695, %v1043_v26  ;;  %v1168_v2 = vld [vmem:[#allocation6 + $0x28] sm:$0xff] }
 0x4e7   :  { %1455 = vpow2.f32 %v1357_v31 }
 0x4e8   :  { %1457 = vpow2.f32 %v1358_v59  ;;  %v1167_v59 = vld [vmem:[#allocation6 + $0x20] sm:$0xff] }
 0x4e9   :  { %v1019_v7 = vpop.f32.mrf.mxu2 }
 0x4ea   :  { %v995_v18 = vpop.f32.mrf.mxu0  ;;  %v1008_v49 = vpop.f32.mrf.mxu1  ;;  %v1063_v5 = vadd.f32 %v1852_v23, %v1019_v7 }
 0x4eb   :  { %v1166_v18 = vld [vmem:[#allocation6 + $0x18] sm:$0xff] }
 0x4ed   :  { %v1456_v20 = vpop.eup %1455 }
 0x4ee   :  { %v1458_v62 = vpop.eup %1457  ;;  %v1027_v57 = vadd.f32 1.0, %v1456_v20  ;;  %v1165_v20 = vld [vmem:[#allocation6 + $0x10] sm:$0xff] }
 0x4ef   :  { %v1047_v42 = vadd.f32 1.0, %v1458_v62 }
 0x4f0   :  { %1459 = vrcp.f32 %v1027_v57  ;;  %v1039_v34 = vand.u32 2147483648, %v1027_v57  ;;  %v1037_v3 = vand.u32 2147483647, %v1027_v57  ;;  %vm1033_vm3 = vweird.f32 %v1027_v57 }
 0x4f1   :  { %1461 = vrcp.f32 %v1047_v42  ;;  %v1021_v4 = vpop.f32.mrf.mxu2  ;;  %v1059_v32 = vand.u32 2147483648, %v1047_v42  ;;  %vm1053_vm7 = vweird.f32 %v1047_v42  ;;  %v1057_v46 = vand.u32 2147483647, %v1047_v42 }
 0x4f2   :  { %v1040_v61 = vor.u32 1.1754944e-38, %v1039_v34  ;;  %vm1038_vm5 = vcmp.eq.f32.partialorder %v1037_v3, 8.507059e+37  ;;  %v1163_v4 = vld [vmem:[#allocation6] sm:$0xff] }
 0x4f3   :  { %v1060_v0 = vor.u32 1.1754944e-38, %v1059_v32  ;;  %vm1058_vm9 = vcmp.eq.f32.partialorder %v1057_v46, 8.507059e+37  ;;  %v2081_v32 = vld [vmem:[#allocation16_spill] sm:$0xff] }
 0x4f6   :  { %v1460_v48 = vpop.eup %1459 }
 0x4f7   :  { %v1462_v9 = vpop.eup %1461  ;;  %v1029_v13 = vmul.f32 %v1460_v48, %v1027_v57  ;;  %vm1034_vm2 = vweird.f32 %v1460_v48  ;;  %v1164_v57 = vld [vmem:[#allocation6 + $0x8] sm:$0xff] }
 0x4f8   :  { %v1049_v15 = vmul.f32 %v1462_v9, %v1047_v42  ;;  %vm1035_vm4 = vmor %vm1033_vm3, %vm1034_vm2  ;;  %vm1054_vm6 = vweird.f32 %v1462_v9 }
 0x4f9   :  { %v1030_v22 = vsub.f32 1.0, %v1029_v13  ;;  %vm1055_vm8 = vmor %vm1053_vm7, %vm1054_vm6 }
 0x4fa   :  { %v1050_v29 = vsub.f32 1.0, %v1049_v15 }
 0x4fb   :  { %v1031_v35 = vmul.f32 %v1460_v48, %v1030_v22 }
 0x4fc   :  { %v1051_v44 = vmul.f32 %v1462_v9, %v1050_v29 }
 0x4fd   :  { %v1032_v52 = vadd.f32 %v1460_v48, %v1031_v35 }
 0x4fe   :  { %v1052_v19 = vadd.f32 %v1462_v9, %v1051_v44 }
 0x4ff   :  { %v1036_v6 = vsel %vm1035_vm4, %v1460_v48, %v1032_v52 }
 0x500   :  { %v1041_v12 = vsel %vm1038_vm5, %v1040_v61, %v1036_v6  ;;  %v1056_v37 = vsel %vm1055_vm8, %v1462_v9, %v1052_v19 }
 0x501   :  { %v1064_v43 = vmul.f32 %v1063_v5, %v1041_v12  ;;  %v1061_v8 = vsel %vm1058_vm9, %v1060_v0, %v1056_v37  ;;  %v1475_v5 = vld [vmem:[%s2068_s4] ss:$0 sm:$0xff] }
 0x502   :  { %v1067_v11 = vsub.f32 1.0, %v1061_v8  ;;  %v1069_v17 = vmul.f32 %v1061_v8, %v978_v63  ;;  %v1171_v63 = vld [vmem:[#allocation6 + $0x40] sm:$0xff] }
 0x503   :  { %v1065_v54 = vadd.f32 %v1064_v43, %v236_v25  ;;  %1190 = vmatpush.msra.mxu2 %v1171_v63  ;;  %v239_v43 = vadd.f32 %v2081_v32, %v1855_v40  ;;  %v1394_v40 = vld [vmem:[%s2070_s6] ss:$0 sm:$0xff] }
 0x505   :  { %1463 = vtanh.f32 %v1065_v54  ;;  %1191 = vmatpush.msra.mxu2 %v1170_v39 }
 0x507   :  { %1192 = vmatpush.msra.mxu2 %v1169_v30 }
 0x509   :  { %1193 = vmatpush.msra.mxu2 %v1168_v2 }
 0x50b   :  { %v1464_v45 = vpop.eup %1463  ;;  %1194 = vmatpush.msra.mxu2 %v1167_v59 }
 0x50c   :  { %v1068_v23 = vmul.f32 %v1464_v45, %v1067_v11 }
 0x50d   :  { %1195 = vmatpush.msra.mxu2 %v1166_v18 }
 0x50e   :  { %v2045_v21 = vadd.f32 %v1069_v17, %v1068_v23 }
 0x50f   :  { %1196 = vmatpush.msra.mxu2 %v1165_v20 }
 0x510   :  { %v1075_v27 = vpack.c.bf16 %v2045_v21, %v2045_v21 }
 0x511   :  { %1197 = vmatpush.msra.mxu2 %v1164_v57 }
 0x512   :  { %1084 = vmatmul.bf16.vlgmr.msra.gmra.mxu3 %v1075_v27  ;;  %1097 = vmatmul.bf16.vlgmr.msra.gmra.mxu0 %v1075_v27 }
 0x513   :  { %1110 = vmatmul.bf16.vlgmr.msra.gmra.mxu1 %v1075_v27  ;;  %1198 = vmatpush.msra.mxu2 %v1163_v4 }
 0x58f   :  { %v1098_v28 = vpop.f32.mrf.mxu0 }
 0x590   :  { %v1135_v58 = vadd.f32 %v1098_v28, %v198_v55  ;;  %v1111_v41 = vpop.f32.mrf.mxu1 }
 0x591   :  { %v1155_v12 = vadd.f32 %v1475_v5, %v1111_v41 }
 0x592   :  { %v1360_v47 = vmul.f32 -1.442695, %v1135_v58 }
 0x594   :  { %1465 = vpow2.f32 %v1360_v47 }
 0x595   :  { %v1085_v1 = vpop.f32.mrf.mxu3 }
 0x596   :  { %v1115_v10 = vadd.f32 %v1085_v1, %v2080_v36 }
 0x597   :  { %v1100_v26 = vpop.f32.mrf.mxu0 }
 0x598   :  { %v1359_v60 = vmul.f32 -1.442695, %v1115_v10  ;;  %v1113_v31 = vpop.f32.mrf.mxu1 }
 0x59a   :  { %v1466_v7 = vpop.eup %1465  ;;  %1467 = vpow2.f32 %v1359_v60 }
 0x59b   :  { %v1139_v49 = vadd.f32 1.0, %v1466_v7 }
 0x59d   :  { %v1087_v62 = vpop.f32.mrf.mxu3  ;;  %1469 = vrcp.f32 %v1139_v49  ;;  %v1151_v46 = vand.u32 2147483648, %v1139_v49  ;;  %vm1145_vm15 = vweird.f32 %v1139_v49  ;;  %v1149_v37 = vand.u32 2147483647, %v1139_v49 }
 0x59f   :  { %v1152_v11 = vor.u32 1.1754944e-38, %v1151_v46  ;;  %vm1150_vm1 = vcmp.eq.f32.partialorder %v1149_v37, 8.507059e+37 }
 0x5a0   :  { %v1468_v42 = vpop.eup %1467 }
 0x5a1   :  { %v1119_v48 = vadd.f32 1.0, %v1468_v42 }
 0x5a3   :  { %1471 = vrcp.f32 %v1119_v48  ;;  %v1470_v9 = vpop.eup %1469  ;;  %v1131_v35 = vand.u32 2147483648, %v1119_v48  ;;  %v1129_v44 = vand.u32 2147483647, %v1119_v48  ;;  %vm1125_vm11 = vweird.f32 %v1119_v48 }
 0x5a4   :  { %v1141_v13 = vmul.f32 %v1470_v9, %v1139_v49  ;;  %vm1146_vm14 = vweird.f32 %v1470_v9 }
 0x5a5   :  { %v1132_v6 = vor.u32 1.1754944e-38, %v1131_v35  ;;  %vm1130_vm13 = vcmp.eq.f32.partialorder %v1129_v44, 8.507059e+37  ;;  %vm1147_vm0 = vmor %vm1145_vm15, %vm1146_vm14 }
 0x5a6   :  { %v1142_v29 = vsub.f32 1.0, %v1141_v13 }
 0x5a8   :  { %v1143_v52 = vmul.f32 %v1470_v9, %v1142_v29 }
 0x5a9   :  { %v1472_v15 = vpop.eup %1471 }
 0x5aa   :  { %v1121_v22 = vmul.f32 %v1472_v15, %v1119_v48  ;;  %vm1126_vm10 = vweird.f32 %v1472_v15  ;;  %v1144_v25 = vadd.f32 %v1470_v9, %v1143_v52 }
 0x5ab   :  { %vm1127_vm12 = vmor %vm1125_vm11, %vm1126_vm10 }
 0x5ac   :  { %v1122_v34 = vsub.f32 1.0, %v1121_v22  ;;  %v1148_v8 = vsel %vm1147_vm0, %v1470_v9, %v1144_v25 }
 0x5ad   :  { %v1153_v45 = vsel %vm1150_vm1, %v1152_v11, %v1148_v8 }
 0x5ae   :  { %v1123_v3 = vmul.f32 %v1472_v15, %v1122_v34  ;;  %v1159_v23 = vsub.f32 1.0, %v1153_v45  ;;  %v1161_v38 = vmul.f32 %v1153_v45, %v2045_v21 }
 0x5b0   :  { %v1124_v61 = vadd.f32 %v1472_v15, %v1123_v3 }
 0x5b2   :  { %v1128_v19 = vsel %vm1127_vm12, %v1472_v15, %v1124_v61 }
 0x5b3   :  { %v1133_v56 = vsel %vm1130_vm13, %v1132_v6, %v1128_v19 }
 0x5b4   :  { %v1156_v54 = vmul.f32 %v1155_v12, %v1133_v56 }
 0x5b6   :  { %v1157_v0 = vadd.f32 %v1156_v54, %v239_v43 }
 0x5b8   :  { %1473 = vtanh.f32 %v1157_v0 }
 0x5be   :  { %v1474_v17 = vpop.eup %1473 }
 0x5bf   :  { %v1160_v27 = vmul.f32 %v1474_v17, %v1159_v23 }
 0x5c1   :  { %v1162_v24 = vadd.f32 %v1161_v38, %v1160_v27 }
 0x5c3   :  { %1199 = vmatmul.f32.vlgmr.msra.gmra.mxu2 %v1162_v24 }
 0x646   :  { %v1200_v51 = vpop.f32.mrf.mxu2 }
 0x647   :  { %v1201_v33 = vadd.f32 %v1394_v40, %v1200_v51 }
 0x649   :  { %1203 = vst [vmem:[#allocation8] sm:$0xff] %v1201_v33 }
 0x64a   :  { %1214 = dma.vmem_to_hbm [thread:$0]  %s1210_s2, 128, %s1212_s16, [#allocation5]  }
 0x64b   :  { %1552 = dma.done.wait [#allocation5], 128  }
 0x64c   :  { %1553 = vsyncadd [#allocation5], 4294967168 }
 0x64d   :  { %1219 = vsyncpa [#allocation4], 1 }
 0x64e   :  { %1220 = vsyncpa [#allocation7], 1 }
 0x64f   :  { %1221 = vsyncpa [#allocation5], 1 }

</bundles_post_ra>
